<compile_context>
chip_gen: v5e
topology: v5e:2x2
jax: 0.10.0
libtpu: 0.0.40
codegen_flags: <defaults>
</compile_context>

<pallas_src>
import jax
import jax.numpy as jnp
from jax.experimental import pallas as pl
from jax.experimental.pallas import tpu as pltpu

# ----------------------------- model sizes (small) ---------------------------
B = 2            # batch
S = 8            # sequence length
H = 32           # hidden size
NH = 4           # num attention heads
DH = H // NH     # head dim
FF = 64          # intermediate (4*H)
L = 2            # num transformer layers
VOCAB = 100
MAX_POS = 16
N_CLASSES = 3
NPAD = 128       # lane-dense padding for the classifier output
LN_EPS = 1e-12   # BERT layernorm eps


# ------------------------------ fused Pallas kernel ---------------------------
def _bert_fused_kernel(emb_ref, mask_ref, eln_g_ref, eln_b_ref,
                       wqkv_ref, bqkv_ref, wo_ref, bo_ref, ln1g_ref, ln1b_ref,
                       w1_ref, b1_ref, w2_ref, b2_ref, ln2g_ref, ln2b_ref,
                       poolw_ref, poolb_ref, outw_ref, outb_ref,
                       o_ref):
    """One batch element of the BERT encoder + pooler + classifier.

    Grid axis 0 is the batch (parallel -> second TC on v7x).  All weights are
    VMEM-resident (constant index_maps); per-step refs: emb (S,H), mask (1,1,S),
    output (S, NPAD)."""

    def layer_norm(h, g, b):
        mean = jnp.mean(h, axis=-1, keepdims=True)
        cen = h - mean
        var = jnp.mean(cen * cen, axis=-1, keepdims=True)
        return cen * jax.lax.rsqrt(var + LN_EPS) * g + b

    def dense(x, w, b):
        # bf16 operands on the MXU, f32 accumulation, f32 bias add.
        return jnp.dot(x.astype(jnp.bfloat16), w,
                       preferred_element_type=jnp.float32) + b

    def erf(z):
        # Abramowitz & Stegun 7.1.26 polynomial erf (max abs err 1.5e-7):
        # exact-GELU semantics of HF bert-base-cased using only EUP exp + VPU ops
        # (portable across Mosaic versions; avoids a lax.erf lowering dependency).
        a1, a2, a3, a4, a5 = (0.254829592, -0.284496736, 1.421413741,
                              -1.453152027, 1.061405429)
        pc = 0.3275911
        az = jnp.abs(z)
        t = 1.0 / (1.0 + pc * az)
        poly = ((((a5 * t + a4) * t + a3) * t + a2) * t + a1) * t
        e = 1.0 - poly * jnp.exp(-az * az)
        return jnp.where(z >= 0.0, e, -e)

    def gelu(y):
        return 0.5 * y * (1.0 + erf(y * 0.7071067811865476))

    # ---- embeddings LayerNorm ----
    x = layer_norm(emb_ref[...], eln_g_ref[...], eln_b_ref[...])      # (S, H)

    # additive key-mask bias: 0 for real tokens, -1e9 for padding
    bias = (1.0 - mask_ref[...]) * -1e9                               # (1, 1, S)

    # ---- transformer layers ----
    # TODO(synk): switch to lax.fori_loop(..., unroll=True) over the stacked
    # (L, ...) weights if L grows beyond a few layers (bounds vreg live ranges).
    for l in range(L):
        # fused Q/K/V projection (1/sqrt(DH) already folded into Wq, bq)
        qkv = dense(x, wqkv_ref[l], bqkv_ref[l])                      # (S, 3H) f32

        def split_heads(off):
            # (S, H) column band -> (NH, S, DH) head-batched tensor (bf16)
            return jnp.stack(
                [qkv[:, off + h * DH: off + (h + 1) * DH] for h in range(NH)],
                axis=0).astype(jnp.bfloat16)

        q = split_heads(0)                                            # (NH, S, DH)
        k = split_heads(H)
        v = split_heads(2 * H)

        # batched attention over all heads at once (bf16 MXU, f32 accumulate)
        s = jnp.einsum('hqd,hkd->hqk', q, k,
                       preferred_element_type=jnp.float32) + bias     # (NH, S, S)
        s = s - jnp.max(s, axis=-1, keepdims=True)
        p = jnp.exp(s)
        p = p * pl.reciprocal(jnp.sum(p, axis=-1, keepdims=True), approx=True)
        ctx = jnp.einsum('hqk,hkd->hqd', p.astype(jnp.bfloat16), v,
                         preferred_element_type=jnp.float32)          # (NH, S, DH)
        # rebuild (S, H) context in registers (no scratch, no masked stores)
        ctx = jnp.concatenate([ctx[h] for h in range(NH)], axis=-1)   # (S, H)
        # TODO(synk): at real S (128-512), tile this with an online-softmax
        # (flash) structure over KV blocks instead of the full (S,S) scores.

        # output projection + residual + LayerNorm
        x = layer_norm(dense(ctx, wo_ref[l], bo_ref[l]) + x,
                       ln1g_ref[l], ln1b_ref[l])

        # FFN (erf-GELU) + residual + LayerNorm
        ff = dense(gelu(dense(x, w1_ref[l], b1_ref[l])), w2_ref[l], b2_ref[l])
        x = layer_norm(ff + x, ln2g_ref[l], ln2b_ref[l])

    # ---- pooler + classifier ----
    # Computed for all S rows (negligible at these sizes) so the only kernel
    # store is a full-width, lane-dense (S, 128) slab; the wrapper keeps the
    # CLS row.  Dropout(p=0.3) is identity at inference.
    pooled = jnp.tanh(dense(x, poolw_ref[...], poolb_ref[...]))       # (S, H)
    o_ref[...] = dense(pooled, outw_ref[...], outb_ref[...])          # (S, NPAD)


# ------------------------------ parameter init --------------------------------
def init_params(key):
    def nrm(k, shape):
        return jax.random.normal(k, shape, jnp.float32) * 0.02

    keys = iter(jax.random.split(key, 8 + L * 16))
    p = {
        "word_emb": nrm(next(keys), (VOCAB, H)),
        "pos_emb": nrm(next(keys), (MAX_POS, H)),
        "type_emb": nrm(next(keys), (2, H)),
        "emb_ln_g": jnp.ones((H,), jnp.float32),
        "emb_ln_b": jnp.zeros((H,), jnp.float32),
        "pool_w": nrm(next(keys), (H, H)),
        "pool_b": jnp.zeros((H,), jnp.float32),
        "out_w": nrm(next(keys), (H, N_CLASSES)),
        "out_b": jnp.zeros((N_CLASSES,), jnp.float32),
        "layers": [],
    }
    for _ in range(L):
        lp = {
            "wq": nrm(next(keys), (H, H)), "bq": jnp.zeros((H,), jnp.float32),
            "wk": nrm(next(keys), (H, H)), "bk": jnp.zeros((H,), jnp.float32),
            "wv": nrm(next(keys), (H, H)), "bv": jnp.zeros((H,), jnp.float32),
            "wo": nrm(next(keys), (H, H)), "bo": jnp.zeros((H,), jnp.float32),
            "ln1_g": jnp.ones((H,), jnp.float32), "ln1_b": jnp.zeros((H,), jnp.float32),
            "w1": nrm(next(keys), (H, FF)), "b1": jnp.zeros((FF,), jnp.float32),
            "w2": nrm(next(keys), (FF, H)), "b2": jnp.zeros((H,), jnp.float32),
            "ln2_g": jnp.ones((H,), jnp.float32), "ln2_b": jnp.zeros((H,), jnp.float32),
        }
        p["layers"].append(lp)
    return p


def pack_params(p):
    """Pack per-layer params into stacked kernel-friendly arrays.

    * Q/K/V weights concatenated into one (H, 3H) matrix per layer.
    * 1/sqrt(DH) attention scale folded into Wq / bq.
    * Matmul weights cast to bf16 (f32 accumulation in-kernel); LN params and
      biases stay f32.
    * Classifier weight/bias zero-padded to 128 output lanes.
    """
    scale = 1.0 / (DH ** 0.5)
    layers = p["layers"]

    def stack_bias(name):  # (L, 1, dim)
        return jnp.stack([lp[name][None, :] for lp in layers])

    packed = {
        "word_emb": p["word_emb"],
        "pos_emb": p["pos_emb"],
        "type_emb": p["type_emb"],
        "emb_ln_g": p["emb_ln_g"][None, :],
        "emb_ln_b": p["emb_ln_b"][None, :],
        "wqkv": jnp.stack([
            jnp.concatenate([lp["wq"] * scale, lp["wk"], lp["wv"]], axis=1)
            for lp in layers]).astype(jnp.bfloat16),                       # (L, H, 3H)
        "bqkv": jnp.stack([
            jnp.concatenate([lp["bq"] * scale, lp["bk"], lp["bv"]])[None, :]
            for lp in layers]),                                            # (L, 1, 3H)
        "wo": jnp.stack([lp["wo"] for lp in layers]).astype(jnp.bfloat16),
        "bo": stack_bias("bo"),
        "ln1_g": stack_bias("ln1_g"), "ln1_b": stack_bias("ln1_b"),
        "w1": jnp.stack([lp["w1"] for lp in layers]).astype(jnp.bfloat16),
        "b1": stack_bias("b1"),
        "w2": jnp.stack([lp["w2"] for lp in layers]).astype(jnp.bfloat16),
        "b2": stack_bias("b2"),
        "ln2_g": stack_bias("ln2_g"), "ln2_b": stack_bias("ln2_b"),
        "pool_w": p["pool_w"].astype(jnp.bfloat16),
        "pool_b": p["pool_b"][None, :],
        "out_w": jnp.zeros((H, NPAD), jnp.float32)
                   .at[:, :N_CLASSES].set(p["out_w"]).astype(jnp.bfloat16),
        "out_b": jnp.zeros((1, NPAD), jnp.float32)
                   .at[0, :N_CLASSES].set(p["out_b"]),
    }
    return packed


# ------------------------------- forward pass ---------------------------------
def bert_sentiment_forward(packed, input_ids, attention_mask):
    # Embedding gather + sum stays in XLA (data-dependent row gather); only
    # token_type 0 is used, matching the reference which never passes
    # token_type_ids.
    emb = (packed["word_emb"][input_ids]
           + packed["pos_emb"][None, :S, :]
           + packed["type_emb"][0][None, None, :]).reshape(B * S, H)
    mask_f = attention_mask.astype(jnp.float32).reshape(B, 1, S)

    inputs = (emb, mask_f,
              packed["emb_ln_g"], packed["emb_ln_b"],
              packed["wqkv"], packed["bqkv"], packed["wo"], packed["bo"],
              packed["ln1_g"], packed["ln1_b"],
              packed["w1"], packed["b1"], packed["w2"], packed["b2"],
              packed["ln2_g"], packed["ln2_b"],
              packed["pool_w"], packed["pool_b"],
              packed["out_w"], packed["out_b"])

    def resident(a):
        # full-array VMEM-resident spec (constant block index -> fetched once)
        zeros = (0,) * a.ndim
        return pl.BlockSpec(a.shape, lambda b, _z=zeros: _z)

    in_specs = [
        pl.BlockSpec((S, H), lambda b: (b, 0)),        # embeddings, per batch
        pl.BlockSpec((1, 1, S), lambda b: (b, 0, 0)),  # attention mask, per batch
    ] + [resident(a) for a in inputs[2:]]              # all weights / LN params

    # TODO(synk): at real bert-base sizes, grid over layers with streamed
    # per-layer weight BlockSpecs and set vmem_limit_bytes explicitly; the
    # all-weights-resident design here is only valid at these toy sizes.
    out = pl.pallas_call(
        _bert_fused_kernel,
        out_shape=jax.ShapeDtypeStruct((B * S, NPAD), jnp.float32),
        grid=(B,),
        in_specs=in_specs,
        out_specs=pl.BlockSpec((S, NPAD), lambda b: (b, 0)),
        compiler_params=pltpu.CompilerParams(
            dimension_semantics=("parallel",)),        # 2nd TC on v7x
    )(*inputs)

    # Row b*S carries the CLS logits for batch b; drop the lane padding.
    return out.reshape(B, S, NPAD)[:, 0, :N_CLASSES]


# ----------------------------------- main --------------------------------------
if __name__ == "__main__":
    key = jax.random.PRNGKey(0)
    k_ids, k_params = jax.random.split(key)

    input_ids = jax.random.randint(k_ids, (B, S), 0, VOCAB, dtype=jnp.int32)
    attention_mask = jnp.array([[1, 1, 1, 1, 1, 1, 1, 1],
                                [1, 1, 1, 1, 1, 1, 0, 0]], dtype=jnp.int32)

    params = pack_params(init_params(k_params))

    fwd = jax.jit(lambda ids, m: bert_sentiment_forward(params, ids, m))
    logits = fwd(input_ids, attention_mask)
    jax.block_until_ready(logits)

    assert logits.shape == (B, N_CLASSES)
    assert bool(jnp.all(jnp.isfinite(logits)))
    print("KERNEL_OK")
</pallas_src>

<mosaic_0001>
module attributes {stable_mosaic.version = 11 : i64} {
  func.func @_bert_fused_kernel(%arg0: i32, %arg1: memref<8x32xf32, #tpu.memory_space<vmem>>, %arg2: memref<1x1x8xf32, #tpu.memory_space<vmem>>, %arg3: memref<1x32xf32, #tpu.memory_space<vmem>>, %arg4: memref<1x32xf32, #tpu.memory_space<vmem>>, %arg5: memref<2x32x96xbf16, #tpu.memory_space<vmem>>, %arg6: memref<2x1x96xf32, #tpu.memory_space<vmem>>, %arg7: memref<2x32x32xbf16, #tpu.memory_space<vmem>>, %arg8: memref<2x1x32xf32, #tpu.memory_space<vmem>>, %arg9: memref<2x1x32xf32, #tpu.memory_space<vmem>>, %arg10: memref<2x1x32xf32, #tpu.memory_space<vmem>>, %arg11: memref<2x32x64xbf16, #tpu.memory_space<vmem>>, %arg12: memref<2x1x64xf32, #tpu.memory_space<vmem>>, %arg13: memref<2x64x32xbf16, #tpu.memory_space<vmem>>, %arg14: memref<2x1x32xf32, #tpu.memory_space<vmem>>, %arg15: memref<2x1x32xf32, #tpu.memory_space<vmem>>, %arg16: memref<2x1x32xf32, #tpu.memory_space<vmem>>, %arg17: memref<32x32xbf16, #tpu.memory_space<vmem>>, %arg18: memref<1x32xf32, #tpu.memory_space<vmem>>, %arg19: memref<32x128xbf16, #tpu.memory_space<vmem>>, %arg20: memref<1x128xf32, #tpu.memory_space<vmem>>, %arg21: memref<8x128xf32, #tpu.memory_space<vmem>>) attributes {dimension_semantics = [#tpu.dimension_semantics<parallel>], iteration_bounds = array<i64: 2>, scalar_prefetch = 0 : i64, scratch_operands = 0 : i64, tpu.core_type = #tpu.core_type<tc>, window_params = [{transform_indices = @transform_0, window_bounds = array<i64: 8, 32>}, {transform_indices = @transform_1, window_bounds = array<i64: 1, 1, 8>}, {pipeline_mode = #tpu.pipeline_mode<synchronous>, transform_indices = @transform_2, window_bounds = array<i64: 1, 32>}, {pipeline_mode = #tpu.pipeline_mode<synchronous>, transform_indices = @transform_3, window_bounds = array<i64: 1, 32>}, {pipeline_mode = #tpu.pipeline_mode<synchronous>, transform_indices = @transform_4, window_bounds = array<i64: 2, 32, 96>}, {pipeline_mode = #tpu.pipeline_mode<synchronous>, transform_indices = @transform_5, window_bounds = array<i64: 2, 1, 96>}, {pipeline_mode = #tpu.pipeline_mode<synchronous>, transform_indices = @transform_6, window_bounds = array<i64: 2, 32, 32>}, {pipeline_mode = #tpu.pipeline_mode<synchronous>, transform_indices = @transform_7, window_bounds = array<i64: 2, 1, 32>}, {pipeline_mode = #tpu.pipeline_mode<synchronous>, transform_indices = @transform_8, window_bounds = array<i64: 2, 1, 32>}, {pipeline_mode = #tpu.pipeline_mode<synchronous>, transform_indices = @transform_9, window_bounds = array<i64: 2, 1, 32>}, {pipeline_mode = #tpu.pipeline_mode<synchronous>, transform_indices = @transform_10, window_bounds = array<i64: 2, 32, 64>}, {pipeline_mode = #tpu.pipeline_mode<synchronous>, transform_indices = @transform_11, window_bounds = array<i64: 2, 1, 64>}, {pipeline_mode = #tpu.pipeline_mode<synchronous>, transform_indices = @transform_12, window_bounds = array<i64: 2, 64, 32>}, {pipeline_mode = #tpu.pipeline_mode<synchronous>, transform_indices = @transform_13, window_bounds = array<i64: 2, 1, 32>}, {pipeline_mode = #tpu.pipeline_mode<synchronous>, transform_indices = @transform_14, window_bounds = array<i64: 2, 1, 32>}, {pipeline_mode = #tpu.pipeline_mode<synchronous>, transform_indices = @transform_15, window_bounds = array<i64: 2, 1, 32>}, {pipeline_mode = #tpu.pipeline_mode<synchronous>, transform_indices = @transform_16, window_bounds = array<i64: 32, 32>}, {pipeline_mode = #tpu.pipeline_mode<synchronous>, transform_indices = @transform_17, window_bounds = array<i64: 1, 32>}, {pipeline_mode = #tpu.pipeline_mode<synchronous>, transform_indices = @transform_18, window_bounds = array<i64: 32, 128>}, {pipeline_mode = #tpu.pipeline_mode<synchronous>, transform_indices = @transform_19, window_bounds = array<i64: 1, 128>}, {transform_indices = @transform_20, window_bounds = array<i64: 8, 128>}]} {
    %c0 = arith.constant 0 : index
    %c0_0 = arith.constant 0 : index
    %0 = vector.load %arg1[%c0, %c0_0] : memref<8x32xf32, #tpu.memory_space<vmem>>, vector<8x32xf32>
    %c0_1 = arith.constant 0 : index
    %c0_2 = arith.constant 0 : index
    %1 = vector.load %arg3[%c0_1, %c0_2] : memref<1x32xf32, #tpu.memory_space<vmem>>, vector<1x32xf32>
    %c0_3 = arith.constant 0 : index
    %c0_4 = arith.constant 0 : index
    %2 = vector.load %arg4[%c0_3, %c0_4] : memref<1x32xf32, #tpu.memory_space<vmem>>, vector<1x32xf32>
    %cst = arith.constant dense<0.000000e+00> : vector<8xf32>
    %3 = vector.multi_reduction <add>, %0, %cst [1] : vector<8x32xf32> to vector<8xf32>
    %4 = vector.shape_cast %3 : vector<8xf32> to vector<8x1xf32>
    %cst_5 = arith.constant 3.200000e+01 : f32
    %5 = vector.broadcast %cst_5 : f32 to vector<8x1xf32>
    %6 = arith.divf %4, %5 : vector<8x1xf32>
    %7 = vector.broadcast %6 : vector<8x1xf32> to vector<8x32xf32>
    %8 = arith.subf %0, %7 : vector<8x32xf32>
    %9 = arith.mulf %8, %8 : vector<8x32xf32>
    %cst_6 = arith.constant dense<0.000000e+00> : vector<8xf32>
    %10 = vector.multi_reduction <add>, %9, %cst_6 [1] : vector<8x32xf32> to vector<8xf32>
    %11 = vector.shape_cast %10 : vector<8xf32> to vector<8x1xf32>
    %cst_7 = arith.constant 3.200000e+01 : f32
    %12 = vector.broadcast %cst_7 : f32 to vector<8x1xf32>
    %13 = arith.divf %11, %12 : vector<8x1xf32>
    %cst_8 = arith.constant 9.99999996E-13 : f32
    %14 = vector.broadcast %cst_8 : f32 to vector<8x1xf32>
    %15 = arith.addf %13, %14 : vector<8x1xf32>
    %16 = math.rsqrt %15 : vector<8x1xf32>
    %17 = vector.broadcast %16 : vector<8x1xf32> to vector<8x32xf32>
    %18 = arith.mulf %8, %17 : vector<8x32xf32>
    %19 = vector.broadcast %1 : vector<1x32xf32> to vector<8x32xf32>
    %20 = arith.mulf %18, %19 : vector<8x32xf32>
    %21 = vector.broadcast %2 : vector<1x32xf32> to vector<8x32xf32>
    %22 = arith.addf %20, %21 : vector<8x32xf32>
    %c0_9 = arith.constant 0 : index
    %c0_10 = arith.constant 0 : index
    %c0_11 = arith.constant 0 : index
    %23 = vector.load %arg2[%c0_9, %c0_10, %c0_11] : memref<1x1x8xf32, #tpu.memory_space<vmem>>, vector<1x1x8xf32>
    %cst_12 = arith.constant 1.000000e+00 : f32
    %24 = vector.broadcast %cst_12 : f32 to vector<1x1x8xf32>
    %25 = arith.subf %24, %23 : vector<1x1x8xf32>
    %cst_13 = arith.constant -1.000000e+09 : f32
    %26 = vector.broadcast %cst_13 : f32 to vector<1x1x8xf32>
    %27 = arith.mulf %25, %26 : vector<1x1x8xf32>
    %c0_14 = arith.constant 0 : index
    %c0_15 = arith.constant 0 : index
    %c0_16 = arith.constant 0 : index
    %28 = vector.load %arg5[%c0_14, %c0_15, %c0_16] : memref<2x32x96xbf16, #tpu.memory_space<vmem>>, vector<1x32x96xbf16>
    %29 = vector.shape_cast %28 : vector<1x32x96xbf16> to vector<32x96xbf16>
    %c0_17 = arith.constant 0 : index
    %c0_18 = arith.constant 0 : index
    %c0_19 = arith.constant 0 : index
    %30 = vector.load %arg6[%c0_17, %c0_18, %c0_19] : memref<2x1x96xf32, #tpu.memory_space<vmem>>, vector<1x1x96xf32>
    %31 = vector.shape_cast %30 : vector<1x1x96xf32> to vector<1x96xf32>
    %32 = arith.truncf %22 : vector<8x32xf32> to vector<8x32xbf16>
    %cst_20 = arith.constant dense<0.000000e+00> : vector<8x96xf32>
    %33 = tpu.matmul %32, %29, %cst_20 {dimension_numbers = #tpu.dot_dimension_numbers<[1], [0], [0], [1], [0, 0, 1, 1], [], []>} : vector<8x32xbf16>, vector<32x96xbf16>, vector<8x96xf32> -> vector<8x96xf32>
    %34 = vector.broadcast %31 : vector<1x96xf32> to vector<8x96xf32>
    %35 = arith.addf %33, %34 : vector<8x96xf32>
    %36 = vector.extract_strided_slice %35 {offsets = [0, 0], sizes = [8, 8], strides = [1, 1]} : vector<8x96xf32> to vector<8x8xf32>
    %37 = vector.extract_strided_slice %35 {offsets = [0, 8], sizes = [8, 8], strides = [1, 1]} : vector<8x96xf32> to vector<8x8xf32>
    %38 = vector.extract_strided_slice %35 {offsets = [0, 16], sizes = [8, 8], strides = [1, 1]} : vector<8x96xf32> to vector<8x8xf32>
    %39 = vector.extract_strided_slice %35 {offsets = [0, 24], sizes = [8, 8], strides = [1, 1]} : vector<8x96xf32> to vector<8x8xf32>
    %40 = vector.shape_cast %36 : vector<8x8xf32> to vector<1x8x8xf32>
    %41 = vector.shape_cast %37 : vector<8x8xf32> to vector<1x8x8xf32>
    %42 = vector.shape_cast %38 : vector<8x8xf32> to vector<1x8x8xf32>
    %43 = vector.shape_cast %39 : vector<8x8xf32> to vector<1x8x8xf32>
    %44 = tpu.concatenate %40, %41, %42, %43 in 0 : vector<1x8x8xf32>, vector<1x8x8xf32>, vector<1x8x8xf32>, vector<1x8x8xf32> -> vector<4x8x8xf32>
    %45 = arith.truncf %44 : vector<4x8x8xf32> to vector<4x8x8xbf16>
    %46 = vector.extract_strided_slice %35 {offsets = [0, 32], sizes = [8, 8], strides = [1, 1]} : vector<8x96xf32> to vector<8x8xf32>
    %47 = vector.extract_strided_slice %35 {offsets = [0, 40], sizes = [8, 8], strides = [1, 1]} : vector<8x96xf32> to vector<8x8xf32>
    %48 = vector.extract_strided_slice %35 {offsets = [0, 48], sizes = [8, 8], strides = [1, 1]} : vector<8x96xf32> to vector<8x8xf32>
    %49 = vector.extract_strided_slice %35 {offsets = [0, 56], sizes = [8, 8], strides = [1, 1]} : vector<8x96xf32> to vector<8x8xf32>
    %50 = vector.shape_cast %46 : vector<8x8xf32> to vector<1x8x8xf32>
    %51 = vector.shape_cast %47 : vector<8x8xf32> to vector<1x8x8xf32>
    %52 = vector.shape_cast %48 : vector<8x8xf32> to vector<1x8x8xf32>
    %53 = vector.shape_cast %49 : vector<8x8xf32> to vector<1x8x8xf32>
    %54 = tpu.concatenate %50, %51, %52, %53 in 0 : vector<1x8x8xf32>, vector<1x8x8xf32>, vector<1x8x8xf32>, vector<1x8x8xf32> -> vector<4x8x8xf32>
    %55 = arith.truncf %54 : vector<4x8x8xf32> to vector<4x8x8xbf16>
    %56 = vector.extract_strided_slice %35 {offsets = [0, 64], sizes = [8, 8], strides = [1, 1]} : vector<8x96xf32> to vector<8x8xf32>
    %57 = vector.extract_strided_slice %35 {offsets = [0, 72], sizes = [8, 8], strides = [1, 1]} : vector<8x96xf32> to vector<8x8xf32>
    %58 = vector.extract_strided_slice %35 {offsets = [0, 80], sizes = [8, 8], strides = [1, 1]} : vector<8x96xf32> to vector<8x8xf32>
    %59 = vector.extract_strided_slice %35 {offsets = [0, 88], sizes = [8, 8], strides = [1, 1]} : vector<8x96xf32> to vector<8x8xf32>
    %60 = vector.shape_cast %56 : vector<8x8xf32> to vector<1x8x8xf32>
    %61 = vector.shape_cast %57 : vector<8x8xf32> to vector<1x8x8xf32>
    %62 = vector.shape_cast %58 : vector<8x8xf32> to vector<1x8x8xf32>
    %63 = vector.shape_cast %59 : vector<8x8xf32> to vector<1x8x8xf32>
    %64 = tpu.concatenate %60, %61, %62, %63 in 0 : vector<1x8x8xf32>, vector<1x8x8xf32>, vector<1x8x8xf32>, vector<1x8x8xf32> -> vector<4x8x8xf32>
    %65 = arith.truncf %64 : vector<4x8x8xf32> to vector<4x8x8xbf16>
    "tpu.trace_start"() <{level = 10 : i32, message = "hqd,hkd->hqk"}> : () -> ()
    %cst_21 = arith.constant dense<0.000000e+00> : vector<4x8x8xf32>
    %66 = tpu.matmul %45, %55, %cst_21 {dimension_numbers = #tpu.dot_dimension_numbers<[2], [2], [1], [1], [0, 0, 0, 1, 1, 1], [0], [0]>} : vector<4x8x8xbf16>, vector<4x8x8xbf16>, vector<4x8x8xf32> -> vector<4x8x8xf32>
    "tpu.trace_stop"() : () -> ()
    %67 = vector.broadcast %27 : vector<1x1x8xf32> to vector<4x8x8xf32>
    %68 = arith.addf %66, %67 : vector<4x8x8xf32>
    %cst_22 = arith.constant dense<0xFF800000> : vector<4x8xf32>
    %69 = vector.multi_reduction <maximumf>, %68, %cst_22 [2] : vector<4x8x8xf32> to vector<4x8xf32>
    %70 = vector.shape_cast %69 : vector<4x8xf32> to vector<4x8x1xf32>
    %71 = vector.broadcast %70 : vector<4x8x1xf32> to vector<4x8x8xf32>
    %72 = arith.subf %68, %71 : vector<4x8x8xf32>
    %73 = math.exp %72 : vector<4x8x8xf32>
    %cst_23 = arith.constant dense<0.000000e+00> : vector<4x8xf32>
    %74 = vector.multi_reduction <add>, %73, %cst_23 [2] : vector<4x8x8xf32> to vector<4x8xf32>
    %75 = vector.shape_cast %74 : vector<4x8xf32> to vector<4x8x1xf32>
    %76 = tpu.reciprocal %75 {approx = true} : vector<4x8x1xf32> -> vector<4x8x1xf32>
    %77 = vector.broadcast %76 : vector<4x8x1xf32> to vector<4x8x8xf32>
    %78 = arith.mulf %73, %77 : vector<4x8x8xf32>
    %79 = arith.truncf %78 : vector<4x8x8xf32> to vector<4x8x8xbf16>
    "tpu.trace_start"() <{level = 10 : i32, message = "hqk,hkd->hqd"}> : () -> ()
    %cst_24 = arith.constant dense<0.000000e+00> : vector<4x8x8xf32>
    %80 = tpu.matmul %79, %65, %cst_24 {dimension_numbers = #tpu.dot_dimension_numbers<[2], [1], [1], [2], [0, 0, 0, 1, 1, 2], [0], [0]>} : vector<4x8x8xbf16>, vector<4x8x8xbf16>, vector<4x8x8xf32> -> vector<4x8x8xf32>
    "tpu.trace_stop"() : () -> ()
    %81 = vector.extract_strided_slice %80 {offsets = [0, 0, 0], sizes = [1, 8, 8], strides = [1, 1, 1]} : vector<4x8x8xf32> to vector<1x8x8xf32>
    %82 = vector.shape_cast %81 : vector<1x8x8xf32> to vector<8x8xf32>
    %83 = vector.extract_strided_slice %80 {offsets = [1, 0, 0], sizes = [1, 8, 8], strides = [1, 1, 1]} : vector<4x8x8xf32> to vector<1x8x8xf32>
    %84 = vector.shape_cast %83 : vector<1x8x8xf32> to vector<8x8xf32>
    %85 = vector.extract_strided_slice %80 {offsets = [2, 0, 0], sizes = [1, 8, 8], strides = [1, 1, 1]} : vector<4x8x8xf32> to vector<1x8x8xf32>
    %86 = vector.shape_cast %85 : vector<1x8x8xf32> to vector<8x8xf32>
    %87 = vector.extract_strided_slice %80 {offsets = [3, 0, 0], sizes = [1, 8, 8], strides = [1, 1, 1]} : vector<4x8x8xf32> to vector<1x8x8xf32>
    %88 = vector.shape_cast %87 : vector<1x8x8xf32> to vector<8x8xf32>
    %89 = tpu.concatenate %82, %84, %86, %88 in 1 : vector<8x8xf32>, vector<8x8xf32>, vector<8x8xf32>, vector<8x8xf32> -> vector<8x32xf32>
    %c0_25 = arith.constant 0 : index
    %c0_26 = arith.constant 0 : index
    %c0_27 = arith.constant 0 : index
    %90 = vector.load %arg7[%c0_25, %c0_26, %c0_27] : memref<2x32x32xbf16, #tpu.memory_space<vmem>>, vector<1x32x32xbf16>
    %91 = vector.shape_cast %90 : vector<1x32x32xbf16> to vector<32x32xbf16>
    %c0_28 = arith.constant 0 : index
    %c0_29 = arith.constant 0 : index
    %c0_30 = arith.constant 0 : index
    %92 = vector.load %arg8[%c0_28, %c0_29, %c0_30] : memref<2x1x32xf32, #tpu.memory_space<vmem>>, vector<1x1x32xf32>
    %93 = vector.shape_cast %92 : vector<1x1x32xf32> to vector<1x32xf32>
    %94 = arith.truncf %89 : vector<8x32xf32> to vector<8x32xbf16>
    %cst_31 = arith.constant dense<0.000000e+00> : vector<8x32xf32>
    %95 = tpu.matmul %94, %91, %cst_31 {dimension_numbers = #tpu.dot_dimension_numbers<[1], [0], [0], [1], [0, 0, 1, 1], [], []>} : vector<8x32xbf16>, vector<32x32xbf16>, vector<8x32xf32> -> vector<8x32xf32>
    %96 = vector.broadcast %93 : vector<1x32xf32> to vector<8x32xf32>
    %97 = arith.addf %95, %96 : vector<8x32xf32>
    %98 = arith.addf %97, %22 : vector<8x32xf32>
    %c0_32 = arith.constant 0 : index
    %c0_33 = arith.constant 0 : index
    %c0_34 = arith.constant 0 : index
    %99 = vector.load %arg9[%c0_32, %c0_33, %c0_34] : memref<2x1x32xf32, #tpu.memory_space<vmem>>, vector<1x1x32xf32>
    %100 = vector.shape_cast %99 : vector<1x1x32xf32> to vector<1x32xf32>
    %c0_35 = arith.constant 0 : index
    %c0_36 = arith.constant 0 : index
    %c0_37 = arith.constant 0 : index
    %101 = vector.load %arg10[%c0_35, %c0_36, %c0_37] : memref<2x1x32xf32, #tpu.memory_space<vmem>>, vector<1x1x32xf32>
    %102 = vector.shape_cast %101 : vector<1x1x32xf32> to vector<1x32xf32>
    %cst_38 = arith.constant dense<0.000000e+00> : vector<8xf32>
    %103 = vector.multi_reduction <add>, %98, %cst_38 [1] : vector<8x32xf32> to vector<8xf32>
    %104 = vector.shape_cast %103 : vector<8xf32> to vector<8x1xf32>
    %cst_39 = arith.constant 3.200000e+01 : f32
    %105 = vector.broadcast %cst_39 : f32 to vector<8x1xf32>
    %106 = arith.divf %104, %105 : vector<8x1xf32>
    %107 = vector.broadcast %106 : vector<8x1xf32> to vector<8x32xf32>
    %108 = arith.subf %98, %107 : vector<8x32xf32>
    %109 = arith.mulf %108, %108 : vector<8x32xf32>
    %cst_40 = arith.constant dense<0.000000e+00> : vector<8xf32>
    %110 = vector.multi_reduction <add>, %109, %cst_40 [1] : vector<8x32xf32> to vector<8xf32>
    %111 = vector.shape_cast %110 : vector<8xf32> to vector<8x1xf32>
    %cst_41 = arith.constant 3.200000e+01 : f32
    %112 = vector.broadcast %cst_41 : f32 to vector<8x1xf32>
    %113 = arith.divf %111, %112 : vector<8x1xf32>
    %cst_42 = arith.constant 9.99999996E-13 : f32
    %114 = vector.broadcast %cst_42 : f32 to vector<8x1xf32>
    %115 = arith.addf %113, %114 : vector<8x1xf32>
    %116 = math.rsqrt %115 : vector<8x1xf32>
    %117 = vector.broadcast %116 : vector<8x1xf32> to vector<8x32xf32>
    %118 = arith.mulf %108, %117 : vector<8x32xf32>
    %119 = vector.broadcast %100 : vector<1x32xf32> to vector<8x32xf32>
    %120 = arith.mulf %118, %119 : vector<8x32xf32>
    %121 = vector.broadcast %102 : vector<1x32xf32> to vector<8x32xf32>
    %122 = arith.addf %120, %121 : vector<8x32xf32>
    %c0_43 = arith.constant 0 : index
    %c0_44 = arith.constant 0 : index
    %c0_45 = arith.constant 0 : index
    %123 = vector.load %arg11[%c0_43, %c0_44, %c0_45] : memref<2x32x64xbf16, #tpu.memory_space<vmem>>, vector<1x32x64xbf16>
    %124 = vector.shape_cast %123 : vector<1x32x64xbf16> to vector<32x64xbf16>
    %c0_46 = arith.constant 0 : index
    %c0_47 = arith.constant 0 : index
    %c0_48 = arith.constant 0 : index
    %125 = vector.load %arg12[%c0_46, %c0_47, %c0_48] : memref<2x1x64xf32, #tpu.memory_space<vmem>>, vector<1x1x64xf32>
    %126 = vector.shape_cast %125 : vector<1x1x64xf32> to vector<1x64xf32>
    %127 = arith.truncf %122 : vector<8x32xf32> to vector<8x32xbf16>
    %cst_49 = arith.constant dense<0.000000e+00> : vector<8x64xf32>
    %128 = tpu.matmul %127, %124, %cst_49 {dimension_numbers = #tpu.dot_dimension_numbers<[1], [0], [0], [1], [0, 0, 1, 1], [], []>} : vector<8x32xbf16>, vector<32x64xbf16>, vector<8x64xf32> -> vector<8x64xf32>
    %129 = vector.broadcast %126 : vector<1x64xf32> to vector<8x64xf32>
    %130 = arith.addf %128, %129 : vector<8x64xf32>
    %cst_50 = arith.constant 5.000000e-01 : f32
    %131 = vector.broadcast %cst_50 : f32 to vector<8x64xf32>
    %132 = arith.mulf %131, %130 : vector<8x64xf32>
    %cst_51 = arith.constant 0.707106769 : f32
    %133 = vector.broadcast %cst_51 : f32 to vector<8x64xf32>
    %134 = arith.mulf %130, %133 : vector<8x64xf32>
    %135 = math.absf %134 : vector<8x64xf32>
    %cst_52 = arith.constant 0.327591091 : f32
    %136 = vector.broadcast %cst_52 : f32 to vector<8x64xf32>
    %137 = arith.mulf %136, %135 : vector<8x64xf32>
    %cst_53 = arith.constant 1.000000e+00 : f32
    %138 = vector.broadcast %cst_53 : f32 to vector<8x64xf32>
    %139 = arith.addf %138, %137 : vector<8x64xf32>
    %cst_54 = arith.constant 1.000000e+00 : f32
    %140 = vector.broadcast %cst_54 : f32 to vector<8x64xf32>
    %141 = arith.divf %140, %139 : vector<8x64xf32>
    %cst_55 = arith.constant 1.06140542 : f32
    %142 = vector.broadcast %cst_55 : f32 to vector<8x64xf32>
    %143 = arith.mulf %142, %141 : vector<8x64xf32>
    %cst_56 = arith.constant -1.45315206 : f32
    %144 = vector.broadcast %cst_56 : f32 to vector<8x64xf32>
    %145 = arith.addf %143, %144 : vector<8x64xf32>
    %146 = arith.mulf %145, %141 : vector<8x64xf32>
    %cst_57 = arith.constant 1.42141378 : f32
    %147 = vector.broadcast %cst_57 : f32 to vector<8x64xf32>
    %148 = arith.addf %146, %147 : vector<8x64xf32>
    %149 = arith.mulf %148, %141 : vector<8x64xf32>
    %cst_58 = arith.constant -0.284496725 : f32
    %150 = vector.broadcast %cst_58 : f32 to vector<8x64xf32>
    %151 = arith.addf %149, %150 : vector<8x64xf32>
    %152 = arith.mulf %151, %141 : vector<8x64xf32>
    %cst_59 = arith.constant 0.254829586 : f32
    %153 = vector.broadcast %cst_59 : f32 to vector<8x64xf32>
    %154 = arith.addf %152, %153 : vector<8x64xf32>
    %155 = arith.mulf %154, %141 : vector<8x64xf32>
    %cst_60 = arith.constant 0.000000e+00 : f32
    %156 = vector.broadcast %cst_60 : f32 to vector<8x64xf32>
    %157 = arith.subf %156, %135 : vector<8x64xf32>
    %158 = arith.mulf %157, %135 : vector<8x64xf32>
    %159 = math.exp %158 : vector<8x64xf32>
    %160 = arith.mulf %155, %159 : vector<8x64xf32>
    %cst_61 = arith.constant 1.000000e+00 : f32
    %161 = vector.broadcast %cst_61 : f32 to vector<8x64xf32>
    %162 = arith.subf %161, %160 : vector<8x64xf32>
    %cst_62 = arith.constant 0.000000e+00 : f32
    %163 = vector.broadcast %cst_62 : f32 to vector<8x64xf32>
    %164 = arith.cmpf oge, %134, %163 : vector<8x64xf32>
    %cst_63 = arith.constant 0.000000e+00 : f32
    %165 = vector.broadcast %cst_63 : f32 to vector<8x64xf32>
    %166 = arith.subf %165, %162 : vector<8x64xf32>
    %167 = arith.select %164, %162, %166 : vector<8x64xi1>, vector<8x64xf32>
    %cst_64 = arith.constant 1.000000e+00 : f32
    %168 = vector.broadcast %cst_64 : f32 to vector<8x64xf32>
    %169 = arith.addf %168, %167 : vector<8x64xf32>
    %170 = arith.mulf %132, %169 : vector<8x64xf32>
    %c0_65 = arith.constant 0 : index
    %c0_66 = arith.constant 0 : index
    %c0_67 = arith.constant 0 : index
    %171 = vector.load %arg13[%c0_65, %c0_66, %c0_67] : memref<2x64x32xbf16, #tpu.memory_space<vmem>>, vector<1x64x32xbf16>
    %172 = vector.shape_cast %171 : vector<1x64x32xbf16> to vector<64x32xbf16>
    %c0_68 = arith.constant 0 : index
    %c0_69 = arith.constant 0 : index
    %c0_70 = arith.constant 0 : index
    %173 = vector.load %arg14[%c0_68, %c0_69, %c0_70] : memref<2x1x32xf32, #tpu.memory_space<vmem>>, vector<1x1x32xf32>
    %174 = vector.shape_cast %173 : vector<1x1x32xf32> to vector<1x32xf32>
    %175 = arith.truncf %170 : vector<8x64xf32> to vector<8x64xbf16>
    %cst_71 = arith.constant dense<0.000000e+00> : vector<8x32xf32>
    %176 = tpu.matmul %175, %172, %cst_71 {dimension_numbers = #tpu.dot_dimension_numbers<[1], [0], [0], [1], [0, 0, 1, 1], [], []>} : vector<8x64xbf16>, vector<64x32xbf16>, vector<8x32xf32> -> vector<8x32xf32>
    %177 = vector.broadcast %174 : vector<1x32xf32> to vector<8x32xf32>
    %178 = arith.addf %176, %177 : vector<8x32xf32>
    %179 = arith.addf %178, %122 : vector<8x32xf32>
    %c0_72 = arith.constant 0 : index
    %c0_73 = arith.constant 0 : index
    %c0_74 = arith.constant 0 : index
    %180 = vector.load %arg15[%c0_72, %c0_73, %c0_74] : memref<2x1x32xf32, #tpu.memory_space<vmem>>, vector<1x1x32xf32>
    %181 = vector.shape_cast %180 : vector<1x1x32xf32> to vector<1x32xf32>
    %c0_75 = arith.constant 0 : index
    %c0_76 = arith.constant 0 : index
    %c0_77 = arith.constant 0 : index
    %182 = vector.load %arg16[%c0_75, %c0_76, %c0_77] : memref<2x1x32xf32, #tpu.memory_space<vmem>>, vector<1x1x32xf32>
    %183 = vector.shape_cast %182 : vector<1x1x32xf32> to vector<1x32xf32>
    %cst_78 = arith.constant dense<0.000000e+00> : vector<8xf32>
    %184 = vector.multi_reduction <add>, %179, %cst_78 [1] : vector<8x32xf32> to vector<8xf32>
    %185 = vector.shape_cast %184 : vector<8xf32> to vector<8x1xf32>
    %cst_79 = arith.constant 3.200000e+01 : f32
    %186 = vector.broadcast %cst_79 : f32 to vector<8x1xf32>
    %187 = arith.divf %185, %186 : vector<8x1xf32>
    %188 = vector.broadcast %187 : vector<8x1xf32> to vector<8x32xf32>
    %189 = arith.subf %179, %188 : vector<8x32xf32>
    %190 = arith.mulf %189, %189 : vector<8x32xf32>
    %cst_80 = arith.constant dense<0.000000e+00> : vector<8xf32>
    %191 = vector.multi_reduction <add>, %190, %cst_80 [1] : vector<8x32xf32> to vector<8xf32>
    %192 = vector.shape_cast %191 : vector<8xf32> to vector<8x1xf32>
    %cst_81 = arith.constant 3.200000e+01 : f32
    %193 = vector.broadcast %cst_81 : f32 to vector<8x1xf32>
    %194 = arith.divf %192, %193 : vector<8x1xf32>
    %cst_82 = arith.constant 9.99999996E-13 : f32
    %195 = vector.broadcast %cst_82 : f32 to vector<8x1xf32>
    %196 = arith.addf %194, %195 : vector<8x1xf32>
    %197 = math.rsqrt %196 : vector<8x1xf32>
    %198 = vector.broadcast %197 : vector<8x1xf32> to vector<8x32xf32>
    %199 = arith.mulf %189, %198 : vector<8x32xf32>
    %200 = vector.broadcast %181 : vector<1x32xf32> to vector<8x32xf32>
    %201 = arith.mulf %199, %200 : vector<8x32xf32>
    %202 = vector.broadcast %183 : vector<1x32xf32> to vector<8x32xf32>
    %203 = arith.addf %201, %202 : vector<8x32xf32>
    %c1 = arith.constant 1 : index
    %c0_83 = arith.constant 0 : index
    %c0_84 = arith.constant 0 : index
    %204 = vector.load %arg5[%c1, %c0_83, %c0_84] : memref<2x32x96xbf16, #tpu.memory_space<vmem>>, vector<1x32x96xbf16>
    %205 = vector.shape_cast %204 : vector<1x32x96xbf16> to vector<32x96xbf16>
    %c1_85 = arith.constant 1 : index
    %c0_86 = arith.constant 0 : index
    %c0_87 = arith.constant 0 : index
    %206 = vector.load %arg6[%c1_85, %c0_86, %c0_87] : memref<2x1x96xf32, #tpu.memory_space<vmem>>, vector<1x1x96xf32>
    %207 = vector.shape_cast %206 : vector<1x1x96xf32> to vector<1x96xf32>
    %208 = arith.truncf %203 : vector<8x32xf32> to vector<8x32xbf16>
    %cst_88 = arith.constant dense<0.000000e+00> : vector<8x96xf32>
    %209 = tpu.matmul %208, %205, %cst_88 {dimension_numbers = #tpu.dot_dimension_numbers<[1], [0], [0], [1], [0, 0, 1, 1], [], []>} : vector<8x32xbf16>, vector<32x96xbf16>, vector<8x96xf32> -> vector<8x96xf32>
    %210 = vector.broadcast %207 : vector<1x96xf32> to vector<8x96xf32>
    %211 = arith.addf %209, %210 : vector<8x96xf32>
    %212 = vector.extract_strided_slice %211 {offsets = [0, 0], sizes = [8, 8], strides = [1, 1]} : vector<8x96xf32> to vector<8x8xf32>
    %213 = vector.extract_strided_slice %211 {offsets = [0, 8], sizes = [8, 8], strides = [1, 1]} : vector<8x96xf32> to vector<8x8xf32>
    %214 = vector.extract_strided_slice %211 {offsets = [0, 16], sizes = [8, 8], strides = [1, 1]} : vector<8x96xf32> to vector<8x8xf32>
    %215 = vector.extract_strided_slice %211 {offsets = [0, 24], sizes = [8, 8], strides = [1, 1]} : vector<8x96xf32> to vector<8x8xf32>
    %216 = vector.shape_cast %212 : vector<8x8xf32> to vector<1x8x8xf32>
    %217 = vector.shape_cast %213 : vector<8x8xf32> to vector<1x8x8xf32>
    %218 = vector.shape_cast %214 : vector<8x8xf32> to vector<1x8x8xf32>
    %219 = vector.shape_cast %215 : vector<8x8xf32> to vector<1x8x8xf32>
    %220 = tpu.concatenate %216, %217, %218, %219 in 0 : vector<1x8x8xf32>, vector<1x8x8xf32>, vector<1x8x8xf32>, vector<1x8x8xf32> -> vector<4x8x8xf32>
    %221 = arith.truncf %220 : vector<4x8x8xf32> to vector<4x8x8xbf16>
    %222 = vector.extract_strided_slice %211 {offsets = [0, 32], sizes = [8, 8], strides = [1, 1]} : vector<8x96xf32> to vector<8x8xf32>
    %223 = vector.extract_strided_slice %211 {offsets = [0, 40], sizes = [8, 8], strides = [1, 1]} : vector<8x96xf32> to vector<8x8xf32>
    %224 = vector.extract_strided_slice %211 {offsets = [0, 48], sizes = [8, 8], strides = [1, 1]} : vector<8x96xf32> to vector<8x8xf32>
    %225 = vector.extract_strided_slice %211 {offsets = [0, 56], sizes = [8, 8], strides = [1, 1]} : vector<8x96xf32> to vector<8x8xf32>
    %226 = vector.shape_cast %222 : vector<8x8xf32> to vector<1x8x8xf32>
    %227 = vector.shape_cast %223 : vector<8x8xf32> to vector<1x8x8xf32>
    %228 = vector.shape_cast %224 : vector<8x8xf32> to vector<1x8x8xf32>
    %229 = vector.shape_cast %225 : vector<8x8xf32> to vector<1x8x8xf32>
    %230 = tpu.concatenate %226, %227, %228, %229 in 0 : vector<1x8x8xf32>, vector<1x8x8xf32>, vector<1x8x8xf32>, vector<1x8x8xf32> -> vector<4x8x8xf32>
    %231 = arith.truncf %230 : vector<4x8x8xf32> to vector<4x8x8xbf16>
    %232 = vector.extract_strided_slice %211 {offsets = [0, 64], sizes = [8, 8], strides = [1, 1]} : vector<8x96xf32> to vector<8x8xf32>
    %233 = vector.extract_strided_slice %211 {offsets = [0, 72], sizes = [8, 8], strides = [1, 1]} : vector<8x96xf32> to vector<8x8xf32>
    %234 = vector.extract_strided_slice %211 {offsets = [0, 80], sizes = [8, 8], strides = [1, 1]} : vector<8x96xf32> to vector<8x8xf32>
    %235 = vector.extract_strided_slice %211 {offsets = [0, 88], sizes = [8, 8], strides = [1, 1]} : vector<8x96xf32> to vector<8x8xf32>
    %236 = vector.shape_cast %232 : vector<8x8xf32> to vector<1x8x8xf32>
    %237 = vector.shape_cast %233 : vector<8x8xf32> to vector<1x8x8xf32>
    %238 = vector.shape_cast %234 : vector<8x8xf32> to vector<1x8x8xf32>
    %239 = vector.shape_cast %235 : vector<8x8xf32> to vector<1x8x8xf32>
    %240 = tpu.concatenate %236, %237, %238, %239 in 0 : vector<1x8x8xf32>, vector<1x8x8xf32>, vector<1x8x8xf32>, vector<1x8x8xf32> -> vector<4x8x8xf32>
    %241 = arith.truncf %240 : vector<4x8x8xf32> to vector<4x8x8xbf16>
    "tpu.trace_start"() <{level = 10 : i32, message = "hqd,hkd->hqk"}> : () -> ()
    %cst_89 = arith.constant dense<0.000000e+00> : vector<4x8x8xf32>
    %242 = tpu.matmul %221, %231, %cst_89 {dimension_numbers = #tpu.dot_dimension_numbers<[2], [2], [1], [1], [0, 0, 0, 1, 1, 1], [0], [0]>} : vector<4x8x8xbf16>, vector<4x8x8xbf16>, vector<4x8x8xf32> -> vector<4x8x8xf32>
    "tpu.trace_stop"() : () -> ()
    %243 = vector.broadcast %27 : vector<1x1x8xf32> to vector<4x8x8xf32>
    %244 = arith.addf %242, %243 : vector<4x8x8xf32>
    %cst_90 = arith.constant dense<0xFF800000> : vector<4x8xf32>
    %245 = vector.multi_reduction <maximumf>, %244, %cst_90 [2] : vector<4x8x8xf32> to vector<4x8xf32>
    %246 = vector.shape_cast %245 : vector<4x8xf32> to vector<4x8x1xf32>
    %247 = vector.broadcast %246 : vector<4x8x1xf32> to vector<4x8x8xf32>
    %248 = arith.subf %244, %247 : vector<4x8x8xf32>
    %249 = math.exp %248 : vector<4x8x8xf32>
    %cst_91 = arith.constant dense<0.000000e+00> : vector<4x8xf32>
    %250 = vector.multi_reduction <add>, %249, %cst_91 [2] : vector<4x8x8xf32> to vector<4x8xf32>
    %251 = vector.shape_cast %250 : vector<4x8xf32> to vector<4x8x1xf32>
    %252 = tpu.reciprocal %251 {approx = true} : vector<4x8x1xf32> -> vector<4x8x1xf32>
    %253 = vector.broadcast %252 : vector<4x8x1xf32> to vector<4x8x8xf32>
    %254 = arith.mulf %249, %253 : vector<4x8x8xf32>
    %255 = arith.truncf %254 : vector<4x8x8xf32> to vector<4x8x8xbf16>
    "tpu.trace_start"() <{level = 10 : i32, message = "hqk,hkd->hqd"}> : () -> ()
    %cst_92 = arith.constant dense<0.000000e+00> : vector<4x8x8xf32>
    %256 = tpu.matmul %255, %241, %cst_92 {dimension_numbers = #tpu.dot_dimension_numbers<[2], [1], [1], [2], [0, 0, 0, 1, 1, 2], [0], [0]>} : vector<4x8x8xbf16>, vector<4x8x8xbf16>, vector<4x8x8xf32> -> vector<4x8x8xf32>
    "tpu.trace_stop"() : () -> ()
    %257 = vector.extract_strided_slice %256 {offsets = [0, 0, 0], sizes = [1, 8, 8], strides = [1, 1, 1]} : vector<4x8x8xf32> to vector<1x8x8xf32>
    %258 = vector.shape_cast %257 : vector<1x8x8xf32> to vector<8x8xf32>
    %259 = vector.extract_strided_slice %256 {offsets = [1, 0, 0], sizes = [1, 8, 8], strides = [1, 1, 1]} : vector<4x8x8xf32> to vector<1x8x8xf32>
    %260 = vector.shape_cast %259 : vector<1x8x8xf32> to vector<8x8xf32>
    %261 = vector.extract_strided_slice %256 {offsets = [2, 0, 0], sizes = [1, 8, 8], strides = [1, 1, 1]} : vector<4x8x8xf32> to vector<1x8x8xf32>
    %262 = vector.shape_cast %261 : vector<1x8x8xf32> to vector<8x8xf32>
    %263 = vector.extract_strided_slice %256 {offsets = [3, 0, 0], sizes = [1, 8, 8], strides = [1, 1, 1]} : vector<4x8x8xf32> to vector<1x8x8xf32>
    %264 = vector.shape_cast %263 : vector<1x8x8xf32> to vector<8x8xf32>
    %265 = tpu.concatenate %258, %260, %262, %264 in 1 : vector<8x8xf32>, vector<8x8xf32>, vector<8x8xf32>, vector<8x8xf32> -> vector<8x32xf32>
    %c1_93 = arith.constant 1 : index
    %c0_94 = arith.constant 0 : index
    %c0_95 = arith.constant 0 : index
    %266 = vector.load %arg7[%c1_93, %c0_94, %c0_95] : memref<2x32x32xbf16, #tpu.memory_space<vmem>>, vector<1x32x32xbf16>
    %267 = vector.shape_cast %266 : vector<1x32x32xbf16> to vector<32x32xbf16>
    %c1_96 = arith.constant 1 : index
    %c0_97 = arith.constant 0 : index
    %c0_98 = arith.constant 0 : index
    %268 = vector.load %arg8[%c1_96, %c0_97, %c0_98] : memref<2x1x32xf32, #tpu.memory_space<vmem>>, vector<1x1x32xf32>
    %269 = vector.shape_cast %268 : vector<1x1x32xf32> to vector<1x32xf32>
    %270 = arith.truncf %265 : vector<8x32xf32> to vector<8x32xbf16>
    %cst_99 = arith.constant dense<0.000000e+00> : vector<8x32xf32>
    %271 = tpu.matmul %270, %267, %cst_99 {dimension_numbers = #tpu.dot_dimension_numbers<[1], [0], [0], [1], [0, 0, 1, 1], [], []>} : vector<8x32xbf16>, vector<32x32xbf16>, vector<8x32xf32> -> vector<8x32xf32>
    %272 = vector.broadcast %269 : vector<1x32xf32> to vector<8x32xf32>
    %273 = arith.addf %271, %272 : vector<8x32xf32>
    %274 = arith.addf %273, %203 : vector<8x32xf32>
    %c1_100 = arith.constant 1 : index
    %c0_101 = arith.constant 0 : index
    %c0_102 = arith.constant 0 : index
    %275 = vector.load %arg9[%c1_100, %c0_101, %c0_102] : memref<2x1x32xf32, #tpu.memory_space<vmem>>, vector<1x1x32xf32>
    %276 = vector.shape_cast %275 : vector<1x1x32xf32> to vector<1x32xf32>
    %c1_103 = arith.constant 1 : index
    %c0_104 = arith.constant 0 : index
    %c0_105 = arith.constant 0 : index
    %277 = vector.load %arg10[%c1_103, %c0_104, %c0_105] : memref<2x1x32xf32, #tpu.memory_space<vmem>>, vector<1x1x32xf32>
    %278 = vector.shape_cast %277 : vector<1x1x32xf32> to vector<1x32xf32>
    %cst_106 = arith.constant dense<0.000000e+00> : vector<8xf32>
    %279 = vector.multi_reduction <add>, %274, %cst_106 [1] : vector<8x32xf32> to vector<8xf32>
    %280 = vector.shape_cast %279 : vector<8xf32> to vector<8x1xf32>
    %cst_107 = arith.constant 3.200000e+01 : f32
    %281 = vector.broadcast %cst_107 : f32 to vector<8x1xf32>
    %282 = arith.divf %280, %281 : vector<8x1xf32>
    %283 = vector.broadcast %282 : vector<8x1xf32> to vector<8x32xf32>
    %284 = arith.subf %274, %283 : vector<8x32xf32>
    %285 = arith.mulf %284, %284 : vector<8x32xf32>
    %cst_108 = arith.constant dense<0.000000e+00> : vector<8xf32>
    %286 = vector.multi_reduction <add>, %285, %cst_108 [1] : vector<8x32xf32> to vector<8xf32>
    %287 = vector.shape_cast %286 : vector<8xf32> to vector<8x1xf32>
    %cst_109 = arith.constant 3.200000e+01 : f32
    %288 = vector.broadcast %cst_109 : f32 to vector<8x1xf32>
    %289 = arith.divf %287, %288 : vector<8x1xf32>
    %cst_110 = arith.constant 9.99999996E-13 : f32
    %290 = vector.broadcast %cst_110 : f32 to vector<8x1xf32>
    %291 = arith.addf %289, %290 : vector<8x1xf32>
    %292 = math.rsqrt %291 : vector<8x1xf32>
    %293 = vector.broadcast %292 : vector<8x1xf32> to vector<8x32xf32>
    %294 = arith.mulf %284, %293 : vector<8x32xf32>
    %295 = vector.broadcast %276 : vector<1x32xf32> to vector<8x32xf32>
    %296 = arith.mulf %294, %295 : vector<8x32xf32>
    %297 = vector.broadcast %278 : vector<1x32xf32> to vector<8x32xf32>
    %298 = arith.addf %296, %297 : vector<8x32xf32>
    %c1_111 = arith.constant 1 : index
    %c0_112 = arith.constant 0 : index
    %c0_113 = arith.constant 0 : index
    %299 = vector.load %arg11[%c1_111, %c0_112, %c0_113] : memref<2x32x64xbf16, #tpu.memory_space<vmem>>, vector<1x32x64xbf16>
    %300 = vector.shape_cast %299 : vector<1x32x64xbf16> to vector<32x64xbf16>
    %c1_114 = arith.constant 1 : index
    %c0_115 = arith.constant 0 : index
    %c0_116 = arith.constant 0 : index
    %301 = vector.load %arg12[%c1_114, %c0_115, %c0_116] : memref<2x1x64xf32, #tpu.memory_space<vmem>>, vector<1x1x64xf32>
    %302 = vector.shape_cast %301 : vector<1x1x64xf32> to vector<1x64xf32>
    %303 = arith.truncf %298 : vector<8x32xf32> to vector<8x32xbf16>
    %cst_117 = arith.constant dense<0.000000e+00> : vector<8x64xf32>
    %304 = tpu.matmul %303, %300, %cst_117 {dimension_numbers = #tpu.dot_dimension_numbers<[1], [0], [0], [1], [0, 0, 1, 1], [], []>} : vector<8x32xbf16>, vector<32x64xbf16>, vector<8x64xf32> -> vector<8x64xf32>
    %305 = vector.broadcast %302 : vector<1x64xf32> to vector<8x64xf32>
    %306 = arith.addf %304, %305 : vector<8x64xf32>
    %cst_118 = arith.constant 5.000000e-01 : f32
    %307 = vector.broadcast %cst_118 : f32 to vector<8x64xf32>
    %308 = arith.mulf %307, %306 : vector<8x64xf32>
    %cst_119 = arith.constant 0.707106769 : f32
    %309 = vector.broadcast %cst_119 : f32 to vector<8x64xf32>
    %310 = arith.mulf %306, %309 : vector<8x64xf32>
    %311 = math.absf %310 : vector<8x64xf32>
    %cst_120 = arith.constant 0.327591091 : f32
    %312 = vector.broadcast %cst_120 : f32 to vector<8x64xf32>
    %313 = arith.mulf %312, %311 : vector<8x64xf32>
    %cst_121 = arith.constant 1.000000e+00 : f32
    %314 = vector.broadcast %cst_121 : f32 to vector<8x64xf32>
    %315 = arith.addf %314, %313 : vector<8x64xf32>
    %cst_122 = arith.constant 1.000000e+00 : f32
    %316 = vector.broadcast %cst_122 : f32 to vector<8x64xf32>
    %317 = arith.divf %316, %315 : vector<8x64xf32>
    %cst_123 = arith.constant 1.06140542 : f32
    %318 = vector.broadcast %cst_123 : f32 to vector<8x64xf32>
    %319 = arith.mulf %318, %317 : vector<8x64xf32>
    %cst_124 = arith.constant -1.45315206 : f32
    %320 = vector.broadcast %cst_124 : f32 to vector<8x64xf32>
    %321 = arith.addf %319, %320 : vector<8x64xf32>
    %322 = arith.mulf %321, %317 : vector<8x64xf32>
    %cst_125 = arith.constant 1.42141378 : f32
    %323 = vector.broadcast %cst_125 : f32 to vector<8x64xf32>
    %324 = arith.addf %322, %323 : vector<8x64xf32>
    %325 = arith.mulf %324, %317 : vector<8x64xf32>
    %cst_126 = arith.constant -0.284496725 : f32
    %326 = vector.broadcast %cst_126 : f32 to vector<8x64xf32>
    %327 = arith.addf %325, %326 : vector<8x64xf32>
    %328 = arith.mulf %327, %317 : vector<8x64xf32>
    %cst_127 = arith.constant 0.254829586 : f32
    %329 = vector.broadcast %cst_127 : f32 to vector<8x64xf32>
    %330 = arith.addf %328, %329 : vector<8x64xf32>
    %331 = arith.mulf %330, %317 : vector<8x64xf32>
    %cst_128 = arith.constant 0.000000e+00 : f32
    %332 = vector.broadcast %cst_128 : f32 to vector<8x64xf32>
    %333 = arith.subf %332, %311 : vector<8x64xf32>
    %334 = arith.mulf %333, %311 : vector<8x64xf32>
    %335 = math.exp %334 : vector<8x64xf32>
    %336 = arith.mulf %331, %335 : vector<8x64xf32>
    %cst_129 = arith.constant 1.000000e+00 : f32
    %337 = vector.broadcast %cst_129 : f32 to vector<8x64xf32>
    %338 = arith.subf %337, %336 : vector<8x64xf32>
    %cst_130 = arith.constant 0.000000e+00 : f32
    %339 = vector.broadcast %cst_130 : f32 to vector<8x64xf32>
    %340 = arith.cmpf oge, %310, %339 : vector<8x64xf32>
    %cst_131 = arith.constant 0.000000e+00 : f32
    %341 = vector.broadcast %cst_131 : f32 to vector<8x64xf32>
    %342 = arith.subf %341, %338 : vector<8x64xf32>
    %343 = arith.select %340, %338, %342 : vector<8x64xi1>, vector<8x64xf32>
    %cst_132 = arith.constant 1.000000e+00 : f32
    %344 = vector.broadcast %cst_132 : f32 to vector<8x64xf32>
    %345 = arith.addf %344, %343 : vector<8x64xf32>
    %346 = arith.mulf %308, %345 : vector<8x64xf32>
    %c1_133 = arith.constant 1 : index
    %c0_134 = arith.constant 0 : index
    %c0_135 = arith.constant 0 : index
    %347 = vector.load %arg13[%c1_133, %c0_134, %c0_135] : memref<2x64x32xbf16, #tpu.memory_space<vmem>>, vector<1x64x32xbf16>
    %348 = vector.shape_cast %347 : vector<1x64x32xbf16> to vector<64x32xbf16>
    %c1_136 = arith.constant 1 : index
    %c0_137 = arith.constant 0 : index
    %c0_138 = arith.constant 0 : index
    %349 = vector.load %arg14[%c1_136, %c0_137, %c0_138] : memref<2x1x32xf32, #tpu.memory_space<vmem>>, vector<1x1x32xf32>
    %350 = vector.shape_cast %349 : vector<1x1x32xf32> to vector<1x32xf32>
    %351 = arith.truncf %346 : vector<8x64xf32> to vector<8x64xbf16>
    %cst_139 = arith.constant dense<0.000000e+00> : vector<8x32xf32>
    %352 = tpu.matmul %351, %348, %cst_139 {dimension_numbers = #tpu.dot_dimension_numbers<[1], [0], [0], [1], [0, 0, 1, 1], [], []>} : vector<8x64xbf16>, vector<64x32xbf16>, vector<8x32xf32> -> vector<8x32xf32>
    %353 = vector.broadcast %350 : vector<1x32xf32> to vector<8x32xf32>
    %354 = arith.addf %352, %353 : vector<8x32xf32>
    %355 = arith.addf %354, %298 : vector<8x32xf32>
    %c1_140 = arith.constant 1 : index
    %c0_141 = arith.constant 0 : index
    %c0_142 = arith.constant 0 : index
    %356 = vector.load %arg15[%c1_140, %c0_141, %c0_142] : memref<2x1x32xf32, #tpu.memory_space<vmem>>, vector<1x1x32xf32>
    %357 = vector.shape_cast %356 : vector<1x1x32xf32> to vector<1x32xf32>
    %c1_143 = arith.constant 1 : index
    %c0_144 = arith.constant 0 : index
    %c0_145 = arith.constant 0 : index
    %358 = vector.load %arg16[%c1_143, %c0_144, %c0_145] : memref<2x1x32xf32, #tpu.memory_space<vmem>>, vector<1x1x32xf32>
    %359 = vector.shape_cast %358 : vector<1x1x32xf32> to vector<1x32xf32>
    %cst_146 = arith.constant dense<0.000000e+00> : vector<8xf32>
    %360 = vector.multi_reduction <add>, %355, %cst_146 [1] : vector<8x32xf32> to vector<8xf32>
    %361 = vector.shape_cast %360 : vector<8xf32> to vector<8x1xf32>
    %cst_147 = arith.constant 3.200000e+01 : f32
    %362 = vector.broadcast %cst_147 : f32 to vector<8x1xf32>
    %363 = arith.divf %361, %362 : vector<8x1xf32>
    %364 = vector.broadcast %363 : vector<8x1xf32> to vector<8x32xf32>
    %365 = arith.subf %355, %364 : vector<8x32xf32>
    %366 = arith.mulf %365, %365 : vector<8x32xf32>
    %cst_148 = arith.constant dense<0.000000e+00> : vector<8xf32>
    %367 = vector.multi_reduction <add>, %366, %cst_148 [1] : vector<8x32xf32> to vector<8xf32>
    %368 = vector.shape_cast %367 : vector<8xf32> to vector<8x1xf32>
    %cst_149 = arith.constant 3.200000e+01 : f32
    %369 = vector.broadcast %cst_149 : f32 to vector<8x1xf32>
    %370 = arith.divf %368, %369 : vector<8x1xf32>
    %cst_150 = arith.constant 9.99999996E-13 : f32
    %371 = vector.broadcast %cst_150 : f32 to vector<8x1xf32>
    %372 = arith.addf %370, %371 : vector<8x1xf32>
    %373 = math.rsqrt %372 : vector<8x1xf32>
    %374 = vector.broadcast %373 : vector<8x1xf32> to vector<8x32xf32>
    %375 = arith.mulf %365, %374 : vector<8x32xf32>
    %376 = vector.broadcast %357 : vector<1x32xf32> to vector<8x32xf32>
    %377 = arith.mulf %375, %376 : vector<8x32xf32>
    %378 = vector.broadcast %359 : vector<1x32xf32> to vector<8x32xf32>
    %379 = arith.addf %377, %378 : vector<8x32xf32>
    %c0_151 = arith.constant 0 : index
    %c0_152 = arith.constant 0 : index
    %380 = vector.load %arg17[%c0_151, %c0_152] : memref<32x32xbf16, #tpu.memory_space<vmem>>, vector<32x32xbf16>
    %c0_153 = arith.constant 0 : index
    %c0_154 = arith.constant 0 : index
    %381 = vector.load %arg18[%c0_153, %c0_154] : memref<1x32xf32, #tpu.memory_space<vmem>>, vector<1x32xf32>
    %382 = arith.truncf %379 : vector<8x32xf32> to vector<8x32xbf16>
    %cst_155 = arith.constant dense<0.000000e+00> : vector<8x32xf32>
    %383 = tpu.matmul %382, %380, %cst_155 {dimension_numbers = #tpu.dot_dimension_numbers<[1], [0], [0], [1], [0, 0, 1, 1], [], []>} : vector<8x32xbf16>, vector<32x32xbf16>, vector<8x32xf32> -> vector<8x32xf32>
    %384 = vector.broadcast %381 : vector<1x32xf32> to vector<8x32xf32>
    %385 = arith.addf %383, %384 : vector<8x32xf32>
    %386 = math.tanh %385 : vector<8x32xf32>
    %c0_156 = arith.constant 0 : index
    %c0_157 = arith.constant 0 : index
    %387 = vector.load %arg19[%c0_156, %c0_157] : memref<32x128xbf16, #tpu.memory_space<vmem>>, vector<32x128xbf16>
    %c0_158 = arith.constant 0 : index
    %c0_159 = arith.constant 0 : index
    %388 = vector.load %arg20[%c0_158, %c0_159] : memref<1x128xf32, #tpu.memory_space<vmem>>, vector<1x128xf32>
    %389 = arith.truncf %386 : vector<8x32xf32> to vector<8x32xbf16>
    %cst_160 = arith.constant dense<0.000000e+00> : vector<8x128xf32>
    %390 = tpu.matmul %389, %387, %cst_160 {dimension_numbers = #tpu.dot_dimension_numbers<[1], [0], [0], [1], [0, 0, 1, 1], [], []>} : vector<8x32xbf16>, vector<32x128xbf16>, vector<8x128xf32> -> vector<8x128xf32>
    %391 = vector.broadcast %388 : vector<1x128xf32> to vector<8x128xf32>
    %392 = arith.addf %390, %391 : vector<8x128xf32>
    %c0_161 = arith.constant 0 : index
    %c0_162 = arith.constant 0 : index
    %393 = vector.load %arg21[%c0_161, %c0_162] : memref<8x128xf32, #tpu.memory_space<vmem>>, vector<8x128xf32>
    tpu.vector_store %arg21[%c0_161, %c0_162], %392 {strides = array<i32>} : memref<8x128xf32, #tpu.memory_space<vmem>>, vector<8x128xf32>,
    return
  }
  func.func @transform_0(%arg0: i32) -> (i32, i32) {
    %c0_i32 = arith.constant 0 : i32
    %c0_i32_0 = arith.constant 0 : i32
    return %arg0, %c0_i32 : i32, i32
  }
  func.func @transform_1(%arg0: i32) -> (i32, i32, i32) {
    %c0_i32 = arith.constant 0 : i32
    %c0_i32_0 = arith.constant 0 : i32
    %c0_i32_1 = arith.constant 0 : i32
    return %arg0, %c0_i32, %c0_i32_0 : i32, i32, i32
  }
  func.func @transform_2(%arg0: i32) -> (i32, i32) {
    %c0_i32 = arith.constant 0 : i32
    %c0_i32_0 = arith.constant 0 : i32
    %c0_i32_1 = arith.constant 0 : i32
    return %c0_i32, %c0_i32_0 : i32, i32
  }
  func.func @transform_3(%arg0: i32) -> (i32, i32) {
    %c0_i32 = arith.constant 0 : i32
    %c0_i32_0 = arith.constant 0 : i32
    %c0_i32_1 = arith.constant 0 : i32
    return %c0_i32, %c0_i32_0 : i32, i32
  }
  func.func @transform_4(%arg0: i32) -> (i32, i32, i32) {
    %c0_i32 = arith.constant 0 : i32
    %c0_i32_0 = arith.constant 0 : i32
    %c0_i32_1 = arith.constant 0 : i32
    %c0_i32_2 = arith.constant 0 : i32
    return %c0_i32, %c0_i32_0, %c0_i32_1 : i32, i32, i32
  }
  func.func @transform_5(%arg0: i32) -> (i32, i32, i32) {
    %c0_i32 = arith.constant 0 : i32
    %c0_i32_0 = arith.constant 0 : i32
    %c0_i32_1 = arith.constant 0 : i32
    %c0_i32_2 = arith.constant 0 : i32
    return %c0_i32, %c0_i32_0, %c0_i32_1 : i32, i32, i32
  }
  func.func @transform_6(%arg0: i32) -> (i32, i32, i32) {
    %c0_i32 = arith.constant 0 : i32
    %c0_i32_0 = arith.constant 0 : i32
    %c0_i32_1 = arith.constant 0 : i32
    %c0_i32_2 = arith.constant 0 : i32
    return %c0_i32, %c0_i32_0, %c0_i32_1 : i32, i32, i32
  }
  func.func @transform_7(%arg0: i32) -> (i32, i32, i32) {
    %c0_i32 = arith.constant 0 : i32
    %c0_i32_0 = arith.constant 0 : i32
    %c0_i32_1 = arith.constant 0 : i32
    %c0_i32_2 = arith.constant 0 : i32
    return %c0_i32, %c0_i32_0, %c0_i32_1 : i32, i32, i32
  }
  func.func @transform_8(%arg0: i32) -> (i32, i32, i32) {
    %c0_i32 = arith.constant 0 : i32
    %c0_i32_0 = arith.constant 0 : i32
    %c0_i32_1 = arith.constant 0 : i32
    %c0_i32_2 = arith.constant 0 : i32
    return %c0_i32, %c0_i32_0, %c0_i32_1 : i32, i32, i32
  }
  func.func @transform_9(%arg0: i32) -> (i32, i32, i32) {
    %c0_i32 = arith.constant 0 : i32
    %c0_i32_0 = arith.constant 0 : i32
    %c0_i32_1 = arith.constant 0 : i32
    %c0_i32_2 = arith.constant 0 : i32
    return %c0_i32, %c0_i32_0, %c0_i32_1 : i32, i32, i32
  }
  func.func @transform_10(%arg0: i32) -> (i32, i32, i32) {
    %c0_i32 = arith.constant 0 : i32
    %c0_i32_0 = arith.constant 0 : i32
    %c0_i32_1 = arith.constant 0 : i32
    %c0_i32_2 = arith.constant 0 : i32
    return %c0_i32, %c0_i32_0, %c0_i32_1 : i32, i32, i32
  }
  func.func @transform_11(%arg0: i32) -> (i32, i32, i32) {
    %c0_i32 = arith.constant 0 : i32
    %c0_i32_0 = arith.constant 0 : i32
    %c0_i32_1 = arith.constant 0 : i32
    %c0_i32_2 = arith.constant 0 : i32
    return %c0_i32, %c0_i32_0, %c0_i32_1 : i32, i32, i32
  }
  func.func @transform_12(%arg0: i32) -> (i32, i32, i32) {
    %c0_i32 = arith.constant 0 : i32
    %c0_i32_0 = arith.constant 0 : i32
    %c0_i32_1 = arith.constant 0 : i32
    %c0_i32_2 = arith.constant 0 : i32
    return %c0_i32, %c0_i32_0, %c0_i32_1 : i32, i32, i32
  }
  func.func @transform_13(%arg0: i32) -> (i32, i32, i32) {
    %c0_i32 = arith.constant 0 : i32
    %c0_i32_0 = arith.constant 0 : i32
    %c0_i32_1 = arith.constant 0 : i32
    %c0_i32_2 = arith.constant 0 : i32
    return %c0_i32, %c0_i32_0, %c0_i32_1 : i32, i32, i32
  }
  func.func @transform_14(%arg0: i32) -> (i32, i32, i32) {
    %c0_i32 = arith.constant 0 : i32
    %c0_i32_0 = arith.constant 0 : i32
    %c0_i32_1 = arith.constant 0 : i32
    %c0_i32_2 = arith.constant 0 : i32
    return %c0_i32, %c0_i32_0, %c0_i32_1 : i32, i32, i32
  }
  func.func @transform_15(%arg0: i32) -> (i32, i32, i32) {
    %c0_i32 = arith.constant 0 : i32
    %c0_i32_0 = arith.constant 0 : i32
    %c0_i32_1 = arith.constant 0 : i32
    %c0_i32_2 = arith.constant 0 : i32
    return %c0_i32, %c0_i32_0, %c0_i32_1 : i32, i32, i32
  }
  func.func @transform_16(%arg0: i32) -> (i32, i32) {
    %c0_i32 = arith.constant 0 : i32
    %c0_i32_0 = arith.constant 0 : i32
    %c0_i32_1 = arith.constant 0 : i32
    return %c0_i32, %c0_i32_0 : i32, i32
  }
  func.func @transform_17(%arg0: i32) -> (i32, i32) {
    %c0_i32 = arith.constant 0 : i32
    %c0_i32_0 = arith.constant 0 : i32
    %c0_i32_1 = arith.constant 0 : i32
    return %c0_i32, %c0_i32_0 : i32, i32
  }
  func.func @transform_18(%arg0: i32) -> (i32, i32) {
    %c0_i32 = arith.constant 0 : i32
    %c0_i32_0 = arith.constant 0 : i32
    %c0_i32_1 = arith.constant 0 : i32
    return %c0_i32, %c0_i32_0 : i32, i32
  }
  func.func @transform_19(%arg0: i32) -> (i32, i32) {
    %c0_i32 = arith.constant 0 : i32
    %c0_i32_0 = arith.constant 0 : i32
    %c0_i32_1 = arith.constant 0 : i32
    return %c0_i32, %c0_i32_0 : i32, i32
  }
  func.func @transform_20(%arg0: i32) -> (i32, i32) {
    %c0_i32 = arith.constant 0 : i32
    %c0_i32_0 = arith.constant 0 : i32
    return %arg0, %c0_i32 : i32, i32
  }
}

</mosaic_0001>

<bundles_post_ra>
// kernel: _lambda_.1
= control target key start
LH: loop header
LB: loop body
LE: loop exit
PB: predicated region body
PF: predicated region fallthrough
CT: control target
= control target key end

     0   :  { %s2606_s0 = inlined_call_operand.vmem [shape: f32[16,32], index: 0, kind: input, shape index: {}]   ;;  %s2607_s1 = inlined_call_operand.vmem [shape: f32[2,1,8], index: 1, kind: input, shape index: {}]   ;;  %s2608_s2 = inlined_call_operand.vmem [shape: f32[1,32], index: 2, kind: input, shape index: {}]   ;;  %s2609_s3 = inlined_call_operand.vmem [shape: f32[1,32], index: 3, kind: input, shape index: {}, may-alias: {3,17}]   ;;  %s2610_s4 = inlined_call_operand.vmem [shape: bf16[2,32,96], index: 4, kind: input, shape index: {}]   ;;  %s2611_s5 = inlined_call_operand.vmem [shape: f32[2,1,96], index: 5, kind: input, shape index: {}]   ;;  %s2612_s6 = inlined_call_operand.vmem [shape: bf16[2,32,32], index: 6, kind: input, shape index: {}]   ;;  %s2613_s7 = inlined_call_operand.vmem [shape: f32[2,1,32], index: 7, kind: input, shape index: {}, may-alias: {7,9,13,15}]   ;;  %s2614_s8 = inlined_call_operand.vmem [shape: f32[2,1,32], index: 8, kind: input, shape index: {}, may-alias: {8,14}]   ;;  %s2615_s9 = inlined_call_operand.vmem [shape: f32[2,1,32], index: 9, kind: input, shape index: {}, may-alias: {7,9,13,15}]   ;;  %s2616_s10 = inlined_call_operand.vmem [shape: bf16[2,32,64], index: 10, kind: input, shape index: {}]   ;;  %s2617_s11 = inlined_call_operand.vmem [shape: f32[2,1,64], index: 11, kind: input, shape index: {}]   ;;  %s2618_s12 = inlined_call_operand.vmem [shape: bf16[2,64,32], index: 12, kind: input, shape index: {}]   ;;  %s2619_s13 = inlined_call_operand.vmem [shape: f32[2,1,32], index: 13, kind: input, shape index: {}, may-alias: {7,9,13,15}]   ;;  %s2620_s14 = inlined_call_operand.vmem [shape: f32[2,1,32], index: 14, kind: input, shape index: {}, may-alias: {8,14}]   ;;  %s2621_s15 = inlined_call_operand.vmem [shape: f32[2,1,32], index: 15, kind: input, shape index: {}, may-alias: {7,9,13,15}]   ;;  %s2622_s16 = inlined_call_operand.vmem [shape: bf16[32,32], index: 16, kind: input, shape index: {}]   ;;  %s2623_s17 = inlined_call_operand.vmem [shape: f32[1,32], index: 17, kind: input, shape index: {}, may-alias: {3,17}]   ;;  %s2624_s18 = inlined_call_operand.vmem [shape: bf16[32,128], index: 18, kind: input, shape index: {}]   ;;  %s2625_s19 = inlined_call_operand.vmem [shape: f32[1,128], index: 19, kind: input, shape index: {}]   ;;  %s2626_s20 = inlined_call_operand.vmem [shape: f32[16,128], index: 20, kind: output, shape index: {}]  }
   0x1   :  { %2631 = sst [smem:[#allocation2_spill]] %s2606_s0 }
   0x2   :  { %2632 = sst [smem:[#allocation3_spill]] %s2607_s1  ;;  %s2292_s1 = smov 0  }
   0x3   :  { %2633 = sst [smem:[#allocation4_spill]] %s2608_s2 }
   0x4   :  { %2634 = sst [smem:[#allocation5_spill]] %s2609_s3 }
   0x5   :  { %2635 = sst [smem:[#allocation6_spill]] %s2610_s4 }
   0x6 LB: > { %s1896_s22 = sadd.s32 4294967295, %s2176_s1   ;;  %p1900_p0 = scmp.ge.s32.totalorder %s2176_s1, 1  ;;  %s2176_s1 = sphi %s2292_s1, %s30_s1  }
   0x7   : > { %p569_p1 = scmp.lt.s32.totalorder %s2176_s1, 3 }
   0x9   : > { %p570_p2 = pnand %p1900_p0, %p569_p1 }
   0xa   : > { %p628_p3 = scmp.lt.s32.totalorder (!%p570_p2), %s1896_s22, 1  ;;  %s2636_s25 = sld [smem:[#allocation2_spill]] (!%p570_p2) }
   0xb   : > { %573 = sbr.rel (%p570_p2) target bundleno = 4593 (0x11f1), region = 100  ;;  %s2637_s28 = sld [smem:[#allocation6_spill]] (!%p570_p2) }
   0xc   : > { %s2638_s21 = sld [smem:[#allocation4_spill]] (!%p570_p2)  ;;  %s2179_s27 = smov (!%p570_p2), 104  }
   0xd   : > { %s2180_s4 = smov (!%p570_p2), 120   ;;  %s2181_s29 = smov (!%p570_p2), 112  }
   0xe   : > { %s2182_s30 = smov (!%p570_p2), 96   ;;  %s2640_s24 = sld [smem:[#allocation3_spill]] (!%p570_p2) }
   0xf   : > { %s2630_s26 = smov (!%p570_p2), 24   ;;  %s2629_s0 = smov (!%p570_p2), 16  }
  0x10   : > { %s2645_s22 = smov (!%p628_p3, %s1896_s22), 1  ;;  %vm643_vm0 = vcmask 261120   ;;  %v2178_v2 = vmov 32.0   ;;  %v2098_v32 = vld [vmem:[%s2611_s5] ss:$0 sm:$0xff]  ;;  %vm743_vm5 = vcmask 64512  }
  0x11   : > { %s2628_s23 = sshll.u32 %s2645_s22, 3  ;;  %2116 = vrcp.f32 %v2178_v2  ;;  %v2056_v14 = vld [vmem:[%s2637_s28 + $0x8] sm:$0xff]  ;;  %v2055_v15 = vld [vmem:[%s2637_s28] sm:$0xff]  ;;  %vm888_vm6 = vcmask 1043456   ;;  %vm981_vm7 = vcmask 130048   ;;  %vm983_vm8 = vcmask 195584  }
  0x12   : > { %s631_s3 = scalar_lea.vmem %s2636_s25, %s2628_s23  ;;  %714 = vmatpush.bf16.msra.mxu0 %v2056_v14  ;;  %v2096_v25 = vld [vmem:[%s2638_s21] ss:$0 sm:$0xff]  ;;  %s2639_s25 = sld [smem:[#allocation5_spill]] }
  0x13   : > { %v640_v0 = vld [vmem:[%s631_s3] sm:$0xff]  ;;  %s2184_s3 = smov 8  }
  0x14   : > { %v644_v1 = vsel %vm643_vm0, %v640_v0, 0.0  ;;  %s634_s2 = scalar_lea.vmem %s2640_s24, %s2645_s22 }
  0x15   : > { %645 = vadd.xlane.f32.xlu0 %v644_v1  ;;  %v681_v59 = vld [vmem:[%s634_s2] sm:$0x1] }
  0x16   : > { %715 = vmatpush.bf16.msra.mxu0 %v2055_v15  ;;  %v682_v60 = vsub.f32 1.0, %v681_v59 }
  0x17   : > { %v2117_v3 = vpop.eup %2116 }
  0x18   : > { %v648_v4 = vmul.f32 32.0, %v2117_v3  ;;  %vm652_vm1 = vweird.f32 %v2117_v3  ;;  %v2097_v28 = vld [vmem:[%s2639_s25] ss:$0 sm:$0xff]  ;;  %v683_v61 = vmul.f32 -1e+09, %v682_v60  ;;  %s2183_s25 = smov 64  }
  0x1a   : > { %v649_v5 = vsub.f32 1.0, %v648_v4  ;;  %v2362_v62 = vperm.slane %v683_v61, 0 }
  0x1c   : > { %v650_v6 = vmul.f32 %v2117_v3, %v649_v5 }
  0x1e   : > { %v651_v7 = vadd.f32 %v2117_v3, %v650_v6 }
  0x20   : > { %v2309_v8 = vsel %vm652_vm1, %v2117_v3, %v651_v7 }
  0x88   : > { %v646_v9 = vpop.xlane.xlu0 %645 }
  0x89   : > { %v654_v10 = vmul.f32 %v2309_v8, %v646_v9 }
  0x8b   : > { %v655_v11 = vsub.f32 %v640_v0, %v654_v10 }
  0x8d   : > { %v656_v12 = vmul.f32 %v655_v11, %v655_v11 }
  0x8f   : > { %v657_v13 = vsel %vm643_vm0, %v656_v12, 0.0 }
  0x90   : > { %658 = vadd.xlane.f32.xlu0 %v657_v13 }
 0x103   : > { %v659_v16 = vpop.xlane.xlu0 %658 }
 0x104   : > { %v660_v17 = vmul.f32 %v659_v16, %v2309_v8 }
 0x106   : > { %v661_v18 = vadd.f32 1e-12, %v660_v17 }
 0x108   : > { %2118 = vrsqrt.f32 %v661_v18  ;;  %vm668_vm3 = vweird.f32 %v661_v18 }
 0x10e   : > { %v2119_v19 = vpop.eup %2118 }
 0x10f   : > { %v663_v20 = vmul.f32 %v2119_v19, %v661_v18  ;;  %vm669_vm2 = vweird.f32 %v2119_v19 }
 0x110   : > { %vm670_vm4 = vmor %vm668_vm3, %vm669_vm2  ;;  %vm1169_vm2 = vcmask 523264  }
 0x111   : > { %v664_v21 = vmul.f32 %v2119_v19, %v663_v20 }
 0x113   : > { %v665_v22 = vmul.f32 0.5, %v664_v21 }
 0x115   : > { %v666_v23 = vsub.f32 1.5, %v665_v22 }
 0x117   : > { %v667_v24 = vmul.f32 %v2119_v19, %v666_v23 }
 0x119   : > { %v671_v26 = vsel %vm670_vm4, %v2119_v19, %v667_v24 }
 0x11a   : > { %v672_v27 = vmul.f32 %v671_v26, %v655_v11 }
 0x11c   : > { %v676_v29 = vmul.f32 %v2096_v25, %v672_v27 }
 0x11e   : > { %v2326_v30 = vadd.f32 %v2097_v28, %v676_v29 }
 0x120   : > { %v689_v31 = vpack.c.bf16 %v2326_v30, %v2326_v30 }
 0x122   : > { %1911 = vmatmul.msk.bf16.vlgmr.msra.gmra.mxu0 %vm643_vm0, %v689_v31 }
 0x19f   : > { %v717_v33 = vpop.f32.mrf.mxu0 }
 0x1a0   : > { %v718_v34 = vadd.f32 %v2098_v32, %v717_v33 }
 0x1a2   : > { %728 = vrot.lane.b32.xlu2 %v718_v34, %s2179_s27  ;;  %722 = vrot.lane.b32.xlu1 %v718_v34, %s2180_s4  ;;  %v731_v44 = vpack.c.bf16 %v718_v34, %v718_v34 }
 0x1a4   : > { %v739_v47 = vunpack.c.l.b16 %v731_v44 }
 0x1a6   : > { %v2344_v50 = vpack.c.b16 %v739_v47, %v739_v47 }
 0x1a7   : > { %v719_v35 = vpop.f32.mrf.mxu0 }
 0x1aa   : > { %725 = vrot.lane.b32.xlu1 %v718_v34, %s2181_s29 }
 0x1fc   : > { %v729_v36 = vpop.permute.xlu2 %728 }
 0x1fd   : > { %v734_v37 = vpack.c.bf16 %v729_v36, %v729_v36 }
 0x1ff   : > { %v812_v38 = vunpack.c.l.b16 %v734_v37 }
 0x201   : > { %v2337_v39 = vpack.c.b16 %v812_v38, %v812_v38 }
 0x203   : > { %814 = vrot.lane.b32.xlu1 %v2337_v39, %s2182_s30 }
 0x214   : > { %v723_v40 = vpop.permute.xlu1 %722 }
 0x215   : > { %v732_v41 = vpack.c.bf16 %v723_v40, %v723_v40 }
 0x217   : > { %v764_v42 = vunpack.c.l.b16 %v732_v41 }
 0x219   : > { %v765_v43 = vpack.c.b16 %v764_v42, %v764_v42 }
 0x21b   : > { %766 = vrot.lane.b32.xlu2 %v765_v43, %s2182_s30 }
 0x21c   : > { %v726_v45 = vpop.permute.xlu1 %725 }
 0x21d   : > { %v733_v46 = vpack.c.bf16 %v726_v45, %v726_v45 }
 0x21f   : > { %v788_v48 = vunpack.c.l.b16 %v733_v46 }
 0x221   : > { %v2342_v49 = vpack.c.b16 %v788_v48, %v788_v48 }
 0x223   : > { %790 = vrot.lane.b32.xlu0 %v2342_v49, %s2182_s30  ;;  %741 = vrot.lane.b32.xlu2 %v2344_v50, %s2182_s30 }
 0x275   : > { %v767_v51 = vpop.permute.xlu2 %766  ;;  %v815_v52 = vpop.permute.xlu1 %814 }
 0x276   : > { %v772_v53 = vsel %vm743_vm5, %v767_v51, 0  ;;  %v820_v54 = vsel %vm743_vm5, %v815_v52, 0 }
 0x277   : > { %781 = vmatpush.bf16.xpose.msra.mxu2 %v772_v53  ;;  %829 = vmatpush.bf16.xpose.msrb.mxu0 %v820_v54 }
 0x27d   : > { %v742_v55 = vpop.permute.xlu2 %741 }
 0x27e   : > { %1913 = vmatmul.msk.bf16.vlgmr.msra.gmra.mxu2 %vm743_vm5, %v732_v41  ;;  %1915 = vmatmul.msk.bf16.vlgmr.msrb.gmra.mxu0 %vm743_vm5, %v734_v37  ;;  %v748_v56 = vsel %vm743_vm5, %v742_v55, 0 }
 0x27f   : > { %757 = vmatpush.bf16.xpose.msra.mxu1 %v748_v56 }
 0x286   : > { %1912 = vmatmul.msk.bf16.vlgmr.msra.gmra.mxu1 %vm743_vm5, %v731_v44 }
 0x295   : > { %v791_v57 = vpop.permute.xlu0 %790 }
 0x296   : > { %v796_v58 = vsel %vm743_vm5, %v791_v57, 0 }
 0x297   : > { %805 = vmatpush.bf16.xpose.msra.mxu3 %v796_v58 }
 0x29e   : > { %1914 = vmatmul.msk.bf16.vlgmr.msra.gmra.mxu3 %vm743_vm5, %v733_v46 }
 0x2fb   : > { %v831_v63 = vpop.f32.mrf.mxu0 }
 0x2fc   : > { %v832_v0 = vadd.f32 %v831_v63, %v2362_v62 }
 0x2fe   : > { %v844_v1 = vsel %vm743_vm5, %v832_v0, -inf }
 0x2ff   : > { %845 = vmax.xlane.f32.xlu0 %v844_v1 }
 0x301   : > { %v783_v2 = vpop.f32.mrf.mxu2 }
 0x302   : > { %v784_v3 = vadd.f32 %v783_v2, %v2362_v62 }
 0x303   : > { %v759_v4 = vpop.f32.mrf.mxu1  ;;  %v833_v5 = vpop.f32.mrf.mxu0 }
 0x304   : > { %v838_v6 = vsel %vm743_vm5, %v784_v3, -inf  ;;  %v760_v13 = vadd.f32 %v759_v4, %v2362_v62 }
 0x305   : > { %839 = vmax.xlane.f32.xlu1 %v838_v6  ;;  %v2058_v6 = vld [vmem:[%s2612_s6 + $0x8] sm:$0xff] }
 0x306   : > { %v835_v15 = vsel %vm743_vm5, %v760_v13, -inf }
 0x309   : > { %v785_v7 = vpop.f32.mrf.mxu2 }
 0x30a   : > { %v2057_v7 = vld [vmem:[%s2612_s6] sm:$0xff] }
 0x30b   : > { %v761_v9 = vpop.f32.mrf.mxu1 }
 0x313   : > { %905 = vrot.lane.b32.xlu0 %v765_v43, %s2183_s25 }
 0x321   : > { %v807_v10 = vpop.f32.mrf.mxu3 }
 0x322   : > { %v808_v11 = vadd.f32 %v807_v10, %v2362_v62 }
 0x324   : > { %v841_v12 = vsel %vm743_vm5, %v808_v11, -inf }
 0x325   : > { %842 = vmax.xlane.f32.xlu2 %v841_v12 }
 0x329   : > { %v809_v14 = vpop.f32.mrf.mxu3 }
 0x32d   : > { %836 = vmax.xlane.f32.xlu2 %v835_v15 }
 0x372   : > { %v846_v16 = vpop.xlane.xlu0 %845 }
 0x373   : > { %v850_v17 = vsub.f32 %v832_v0, %v846_v16  ;;  %v2099_v16 = vld [vmem:[%s2613_s7] ss:$0 sm:$0xff] }
 0x375   : > { %v857_v18 = vmul.f32 1.442695, %v850_v17 }
 0x377   : > { %2120 = vpow2.f32 %v857_v18 }
 0x378   : > { %v840_v19 = vpop.xlane.xlu1 %839 }
 0x379   : > { %v848_v20 = vsub.f32 %v784_v3, %v840_v19 }
 0x37b   : > { %v853_v21 = vmul.f32 1.442695, %v848_v20 }
 0x37d   : > { %v2121_v22 = vpop.eup %2120  ;;  %2122 = vpow2.f32 %v853_v21 }
 0x37e   : > { %v868_v23 = vsel %vm743_vm5, %v2121_v22, 0.0 }
 0x37f   : > { %869 = vadd.xlane.f32.xlu1 %v868_v23 }
 0x383   : > { %v2123_v24 = vpop.eup %2122 }
 0x384   : > { %v862_v27 = vsel %vm743_vm5, %v2123_v24, 0.0 }
 0x385   : > { %v906_v25 = vpop.permute.xlu0 %905 }
 0x386   : > { %v911_v26 = vsel %vm888_vm6, %v906_v25, 0 }
 0x387   : > { %920 = vmatpush.bf16.msrb.mxu2 %v911_v26  ;;  %863 = vadd.xlane.f32.xlu1 %v862_v27  ;;  %v2060_v27 = vld [vmem:[%s2616_s10 + $0x8] sm:$0xff] }
 0x38b   : > { %1085 = vmatpush.bf16.msra.mxu2 %v2060_v27 }
 0x398   : > { %v843_v28 = vpop.xlane.xlu2 %842 }
 0x399   : > { %v849_v29 = vsub.f32 %v808_v11, %v843_v28 }
 0x39b   : > { %v855_v31 = vmul.f32 1.442695, %v849_v29 }
 0x39d   : > { %2124 = vpow2.f32 %v855_v31 }
 0x3a0   : > { %947 = vrot.lane.b32.xlu1 %v2337_v39, %s2183_s25  ;;  %v837_v32 = vpop.xlane.xlu2 %836 }
 0x3a1   : > { %v847_v33 = vsub.f32 %v760_v13, %v837_v32 }
 0x3a3   : > { %v2125_v34 = vpop.eup %2124  ;;  %v851_v35 = vmul.f32 1.442695, %v847_v33 }
 0x3a4   : > { %v865_v36 = vsel %vm743_vm5, %v2125_v34, 0.0 }
 0x3a5   : > { %2126 = vpow2.f32 %v851_v35  ;;  %866 = vadd.xlane.f32.xlu2 %v865_v36 }
 0x3ab   : > { %v2127_v37 = vpop.eup %2126 }
 0x3ac   : > { %v859_v38 = vsel %vm743_vm5, %v2127_v37, 0.0 }
 0x3ad   : > { %860 = vadd.xlane.f32.xlu0 %v859_v38  ;;  %v2100_v38 = vld [vmem:[%s2614_s8] ss:$0 sm:$0xff] }
 0x3bd   : > { %926 = vrot.lane.b32.xlu2 %v2342_v49, %s2183_s25 }
 0x3c5   : > { %883 = vrot.lane.b32.xlu2 %v2344_v50, %s2183_s25 }
 0x3f2   : > { %v870_v40 = vpop.xlane.xlu1 %869 }
 0x3fa   : > { %v864_v39 = vpop.xlane.xlu1 %863 }
 0x3fb   : > { %2128 = vrcp.f32 %v864_v39  ;;  %v2101_v39 = vld [vmem:[%s2615_s9] ss:$0 sm:$0xff] }
 0x3fc   : > { %2130 = vrcp.f32 %v870_v40 }
 0x401   : > { %v2129_v41 = vpop.eup %2128 }
 0x402   : > { %v876_v42 = vmul.f32 %v2129_v41, %v2123_v24  ;;  %v2131_v44 = vpop.eup %2130 }
 0x403   : > { %v878_v45 = vmul.f32 %v2131_v44, %v2121_v22 }
 0x404   : > { %v880_v43 = vpack.c.bf16 %v876_v42, %v876_v42 }
 0x405   : > { %v882_v48 = vpack.c.bf16 %v878_v45, %v878_v45  ;;  %v2102_v45 = vld [vmem:[%s2617_s11] ss:$0 sm:$0xff] }
 0x406   : > { %1917 = vmatmul.msk.bf16.vlgmr.msrb.gmra.mxu2 %vm743_vm5, %v880_v43 }
 0x412   : > { %v948_v46 = vpop.permute.xlu1 %947 }
 0x413   : > { %v953_v47 = vsel %vm888_vm6, %v948_v46, 0 }
 0x414   : > { %962 = vmatpush.bf16.msra.mxu0 %v953_v47 }
 0x417   : > { %1919 = vmatmul.msk.bf16.vlgmr.msra.gmra.mxu0 %vm743_vm5, %v882_v48 }
 0x418   : > { %v867_v49 = vpop.xlane.xlu2 %866 }
 0x419   : > { %2132 = vrcp.f32 %v867_v49 }
 0x41f   : > { %v2133_v50 = vpop.eup %2132 }
 0x420   : > { %v877_v51 = vmul.f32 %v2133_v50, %v2125_v34  ;;  %v861_v52 = vpop.xlane.xlu0 %860  ;;  %v927_v53 = vpop.permute.xlu2 %926 }
 0x421   : > { %2134 = vrcp.f32 %v861_v52  ;;  %v932_v54 = vsel %vm888_vm6, %v927_v53, 0  ;;  %v2064_v53 = vld [vmem:[%s2618_s12 + $0x18] sm:$0xff] }
 0x422   : > { %941 = vmatpush.bf16.msrb.mxu3 %v932_v54  ;;  %v881_v55 = vpack.c.bf16 %v877_v51, %v877_v51  ;;  %v2063_v54 = vld [vmem:[%s2618_s12 + $0x10] sm:$0xff] }
 0x425   : > { %1918 = vmatmul.msk.bf16.vlgmr.msrb.gmra.mxu3 %vm743_vm5, %v881_v55 }
 0x426   : > { %1177 = vmatpush.bf16.msra.mxu3 %v2064_v53 }
 0x427   : > { %v2135_v56 = vpop.eup %2134 }
 0x428   : > { %v875_v57 = vmul.f32 %v2135_v56, %v2127_v37  ;;  %v884_v58 = vpop.permute.xlu2 %883 }
 0x429   : > { %v890_v59 = vsel %vm888_vm6, %v884_v58, 0 }
 0x42a   : > { %899 = vmatpush.bf16.msrb.mxu1 %v890_v59  ;;  %v879_v60 = vpack.c.bf16 %v875_v57, %v875_v57  ;;  %1178 = vmatpush.bf16.msra.mxu3 %v2063_v54  ;;  %v2062_v57 = vld [vmem:[%s2618_s12 + $0x8] sm:$0xff] }
 0x42d   : > { %1916 = vmatmul.msk.bf16.vlgmr.msrb.gmra.mxu1 %vm743_vm5, %v879_v60 }
 0x42e   : > { %1015 = vmatpush.bf16.msra.mxu1 %v2058_v6  ;;  %1179 = vmatpush.bf16.msra.mxu3 %v2062_v57 }
 0x432   : > { %1016 = vmatpush.bf16.msra.mxu1 %v2057_v7 }
 0x489   : > { %v922_v61 = vpop.f32.mrf.mxu2 }
 0x48a   : > { %969 = vrot.lane.b32.xlu1 %v922_v61, %s2184_s3 }
 0x491   : > { %v924_v63 = vpop.f32.mrf.mxu2 }
 0x492   : > { %v2061_v63 = vld [vmem:[%s2618_s12] sm:$0xff] }
 0x493   : > { %1180 = vmatpush.bf16.msra.mxu3 %v2061_v63 }
 0x494   : > { %v964_v0 = vpop.f32.mrf.mxu0 }
 0x495   : > { %977 = vrot.lane.b32.xlu1 %v964_v0, %s2630_s26  ;;  %s2643_s26 = sshll.u32 %s2645_s22, 3 }
 0x496   : > { %s638_s2 = scalar_lea.vmem %s2626_s20, %s2643_s26 }
 0x49c   : > { %v966_v1 = vpop.f32.mrf.mxu0 }
 0x4a8   : > { %v943_v2 = vpop.f32.mrf.mxu3 }
 0x4a9   : > { %973 = vrot.lane.b32.xlu2 %v943_v2, %s2629_s0 }
 0x4aa   : > { %v901_v3 = vpop.f32.mrf.mxu1 }
 0x4b0   : > { %v945_v4 = vpop.f32.mrf.mxu3 }
 0x4b2   : > { %v903_v5 = vpop.f32.mrf.mxu1 }
 0x4fc   : > { %v970_v9 = vpop.permute.xlu1 %969 }
 0x4fd   : > { %v980_v11 = vsel %vm743_vm5, %v901_v3, %v970_v9 }
 0x503   : > { %v974_v10 = vpop.permute.xlu2 %973 }
 0x504   : > { %v982_v12 = vsel %vm981_vm7, %v980_v11, %v974_v10 }
 0x507   : > { %v978_v13 = vpop.permute.xlu1 %977 }
 0x508   : > { %v984_v14 = vsel %vm983_vm8, %v982_v12, %v978_v13 }
 0x509   : > { %v990_v15 = vpack.c.bf16 %v984_v14, %v984_v14 }
 0x50b   : > { %1928 = vmatmul.msk.bf16.vlgmr.msra.gmra.mxu1 %vm643_vm0, %v990_v15 }
 0x588   : > { %v1018_v17 = vpop.f32.mrf.mxu1 }
 0x589   : > { %v1019_v18 = vadd.f32 %v2099_v16, %v1018_v17 }
 0x58b   : > { %v1022_v19 = vadd.f32 %v1019_v18, %v2326_v30  ;;  %v2059_v30 = vld [vmem:[%s2616_s10] sm:$0xff] }
 0x58c   : > { %1086 = vmatpush.bf16.msra.mxu2 %v2059_v30 }
 0x58d   : > { %v1025_v20 = vsel %vm643_vm0, %v1022_v19, 0.0 }
 0x58e   : > { %1026 = vadd.xlane.f32.xlu2 %v1025_v20 }
 0x590   : > { %v1020_v21 = vpop.f32.mrf.mxu1 }
 0x601   : > { %v1027_v22 = vpop.xlane.xlu2 %1026 }
 0x602   : > { %v1028_v23 = vmul.f32 %v1027_v22, %v2309_v8 }
 0x604   : > { %v1029_v24 = vsub.f32 %v1022_v19, %v1028_v23 }
 0x606   : > { %v1030_v25 = vmul.f32 %v1029_v24, %v1029_v24 }
 0x608   : > { %v1031_v26 = vsel %vm643_vm0, %v1030_v25, 0.0 }
 0x609   : > { %1032 = vadd.xlane.f32.xlu1 %v1031_v26  ;;  %v2103_v26 = vld [vmem:[%s2619_s13] ss:$0 sm:$0xff] }
 0x67c   : > { %v1033_v28 = vpop.xlane.xlu1 %1032 }
 0x67d   : > { %v1034_v29 = vmul.f32 %v1033_v28, %v2309_v8 }
 0x67f   : > { %v1035_v31 = vadd.f32 1e-12, %v1034_v29 }
 0x681   : > { %2136 = vrsqrt.f32 %v1035_v31  ;;  %vm1042_vm10 = vweird.f32 %v1035_v31 }
 0x687   : > { %v2137_v32 = vpop.eup %2136 }
 0x688   : > { %v1037_v33 = vmul.f32 %v2137_v32, %v1035_v31  ;;  %vm1043_vm9 = vweird.f32 %v2137_v32 }
 0x689   : > { %vm1044_vm11 = vmor %vm1042_vm10, %vm1043_vm9 }
 0x68a   : > { %v1038_v34 = vmul.f32 %v2137_v32, %v1037_v33 }
 0x68c   : > { %v1039_v35 = vmul.f32 0.5, %v1038_v34 }
 0x68e   : > { %v1040_v36 = vsub.f32 1.5, %v1039_v35 }
 0x690   : > { %v1041_v37 = vmul.f32 %v2137_v32, %v1040_v36 }
 0x692   : > { %v1045_v40 = vsel %vm1044_vm11, %v2137_v32, %v1041_v37  ;;  %v2066_v37 = vld [vmem:[%s2637_s28 + $0x18] sm:$0xff] }
 0x693   : > { %v1046_v41 = vmul.f32 %v1045_v40, %v1029_v24  ;;  %1251 = vmatpush.bf16.msrb.mxu0 %v2066_v37 }
 0x695   : > { %v1050_v42 = vmul.f32 %v2100_v38, %v1046_v41  ;;  %v2065_v38 = vld [vmem:[%s2637_s28 + $0x10] sm:$0xff] }
 0x697   : > { %v1054_v43 = vadd.f32 %v2101_v39, %v1050_v42  ;;  %1252 = vmatpush.bf16.msrb.mxu0 %v2065_v38 }
 0x699   : > { %v1060_v44 = vpack.c.bf16 %v1054_v43, %v1054_v43 }
 0x69b   : > { %1937 = vmatmul.msk.bf16.vlgmr.msra.gmra.mxu2 %vm643_vm0, %v1060_v44 }
 0x71e   : > { %v1088_v46 = vpop.f32.mrf.mxu2 }
 0x71f   : > { %v1089_v47 = vadd.f32 %v2102_v45, %v1088_v46 }
 0x721   : > { %v1093_v48 = vmul.f32 0.70710677, %v1089_v47  ;;  %v1092_v22 = vmul.f32 0.5, %v1089_v47 }
 0x723   : > { %v1094_v49 = vand.u32 2147483647, %v1093_v48  ;;  %vm1127_vm1 = vcmp.ge.f32.partialorder %v1093_v48, 0.0  ;;  %v2104_v48 = vld [vmem:[%s2620_s14] ss:$0 sm:$0xff] }
 0x725   : > { %v1095_v50 = vmul.f32 0.3275911, %v1094_v49  ;;  %v1121_v4 = vsub.f32 0.0, %v1094_v49 }
 0x726   : > { %v1090_v51 = vpop.f32.mrf.mxu2 }
 0x727   : > { %v1096_v52 = vadd.f32 1.0, %v1095_v50  ;;  %v1122_v7 = vmul.f32 %v1121_v4, %v1094_v49  ;;  %v2105_v50 = vld [vmem:[%s2621_s15] ss:$0 sm:$0xff] }
 0x729   : > { %2138 = vrcp.f32 %v1096_v52  ;;  %v1108_v59 = vand.u32 2147483648, %v1096_v52  ;;  %v1106_v61 = vand.u32 2147483647, %v1096_v52  ;;  %vm1102_vm13 = vweird.f32 %v1096_v52 }
 0x72a   : > { %v1123_v11 = vmul.f32 1.442695, %v1122_v7 }
 0x72b   : > { %v1109_v1 = vor.u32 1.1754944e-38, %v1108_v59  ;;  %vm1107_vm15 = vcmp.eq.f32.partialorder %v1106_v61, 8.507059e+37 }
 0x72c   : > { %2140 = vpow2.f32 %v1123_v11 }
 0x72f   : > { %v2139_v55 = vpop.eup %2138 }
 0x730   : > { %v1098_v56 = vmul.f32 %v2139_v55, %v1096_v52  ;;  %vm1103_vm12 = vweird.f32 %v2139_v55 }
 0x731   : > { %vm1104_vm14 = vmor %vm1102_vm13, %vm1103_vm12 }
 0x732   : > { %v1099_v58 = vsub.f32 1.0, %v1098_v56  ;;  %v2141_v17 = vpop.eup %2140 }
 0x734   : > { %v1100_v60 = vmul.f32 %v2139_v55, %v1099_v58 }
 0x736   : > { %v1101_v0 = vadd.f32 %v2139_v55, %v1100_v60 }
 0x738   : > { %v1105_v2 = vsel %vm1104_vm14, %v2139_v55, %v1101_v0  ;;  %v2106_v55 = vld [vmem:[%s2611_s5 + $0x1] ss:$0 sm:$0xff] }
 0x739   : > { %v1110_v3 = vsel %vm1107_vm15, %v1109_v1, %v1105_v2 }
 0x73a   : > { %v1112_v5 = vmul.f32 1.0614054, %v1110_v3 }
 0x73c   : > { %v1113_v6 = vadd.f32 -1.4531521, %v1112_v5 }
 0x73e   : > { %v1114_v9 = vmul.f32 %v1113_v6, %v1110_v3 }
 0x740   : > { %v1115_v10 = vadd.f32 1.4214138, %v1114_v9 }
 0x742   : > { %v1116_v12 = vmul.f32 %v1115_v10, %v1110_v3 }
 0x744   : > { %v1117_v13 = vadd.f32 -0.28449672, %v1116_v12 }
 0x746   : > { %v1118_v14 = vmul.f32 %v1117_v13, %v1110_v3 }
 0x748   : > { %v1119_v15 = vadd.f32 0.2548296, %v1118_v14 }
 0x74a   : > { %v1120_v16 = vmul.f32 %v1119_v15, %v1110_v3 }
 0x74c   : > { %v1125_v18 = vmul.f32 %v2141_v17, %v1120_v16 }
 0x74e   : > { %v1126_v19 = vsub.f32 1.0, %v1125_v18 }
 0x750   : > { %v1128_v20 = vsub.f32 0.0, %v1126_v19 }
 0x752   : > { %v1129_v21 = vsel %vm1127_vm1, %v1126_v19, %v1128_v20 }
 0x753   : > { %v1130_v23 = vadd.f32 1.0, %v1129_v21 }
 0x755   : > { %v1131_v24 = vmul.f32 %v1130_v23, %v1092_v22 }
 0x757   : > { %v1141_v25 = vpack.c.bf16 %v1131_v24, %v1131_v24 }
 0x759   : > { %1954 = vmatmul.msk.bf16.vlgmr.msra.gmra.mxu3 %vm1169_vm2, %v1141_v25 }
 0x7dc   : > { %v1182_v27 = vpop.f32.mrf.mxu3 }
 0x7dd   : > { %v1183_v30 = vadd.f32 %v2103_v26, %v1182_v27 }
 0x7df   : > { %v1186_v28 = vadd.f32 %v1183_v30, %v1054_v43 }
 0x7e1   : > { %v1189_v29 = vsel %vm643_vm0, %v1186_v28, 0.0 }
 0x7e2   : > { %1190 = vadd.xlane.f32.xlu0 %v1189_v29 }
 0x7e4   : > { %v1184_v31 = vpop.f32.mrf.mxu3 }
 0x855   : > { %v1191_v32 = vpop.xlane.xlu0 %1190 }
 0x856   : > { %v1192_v33 = vmul.f32 %v1191_v32, %v2309_v8 }
 0x858   : > { %v1193_v34 = vsub.f32 %v1186_v28, %v1192_v33 }
 0x85a   : > { %v1194_v35 = vmul.f32 %v1193_v34, %v1193_v34 }
 0x85c   : > { %v1195_v36 = vsel %vm643_vm0, %v1194_v35, 0.0 }
 0x85d   : > { %1196 = vadd.xlane.f32.xlu0 %v1195_v36 }
 0x8d0   : > { %v1197_v40 = vpop.xlane.xlu0 %1196 }
 0x8d1   : > { %v1198_v39 = vmul.f32 %v1197_v40, %v2309_v8 }
 0x8d3   : > { %v1199_v41 = vadd.f32 1e-12, %v1198_v39 }
 0x8d5   : > { %2142 = vrsqrt.f32 %v1199_v41  ;;  %vm1206_vm4 = vweird.f32 %v1199_v41 }
 0x8db   : > { %v2143_v42 = vpop.eup %2142 }
 0x8dc   : > { %v1201_v43 = vmul.f32 %v2143_v42, %v1199_v41  ;;  %vm1207_vm3 = vweird.f32 %v2143_v42 }
 0x8dd   : > { %vm1208_vm9 = vmor %vm1206_vm4, %vm1207_vm3 }
 0x8de   : > { %v1202_v44 = vmul.f32 %v2143_v42, %v1201_v43 }
 0x8e0   : > { %v1203_v45 = vmul.f32 0.5, %v1202_v44 }
 0x8e2   : > { %v1204_v46 = vsub.f32 1.5, %v1203_v45 }
 0x8e4   : > { %v1205_v47 = vmul.f32 %v2143_v42, %v1204_v46 }
 0x8e6   : > { %v1209_v49 = vsel %vm1208_vm9, %v2143_v42, %v1205_v47 }
 0x8e7   : > { %v1210_v51 = vmul.f32 %v1209_v49, %v1193_v34 }
 0x8e9   : > { %v1214_v52 = vmul.f32 %v2104_v48, %v1210_v51 }
 0x8eb   : > { %v2460_v53 = vadd.f32 %v2105_v50, %v1214_v52 }
 0x8ed   : > { %v1226_v54 = vpack.c.bf16 %v2460_v53, %v2460_v53 }
 0x8ef   : > { %1968 = vmatmul.msk.bf16.vlgmr.msrb.gmra.mxu0 %vm643_vm0, %v1226_v54 }
 0x96c   : > { %v1254_v56 = vpop.f32.mrf.mxu0 }
 0x96d   : > { %v1255_v57 = vadd.f32 %v2106_v55, %v1254_v56 }
 0x96f   : > { %1265 = vrot.lane.b32.xlu1 %v1255_v57, %s2179_s27  ;;  %1262 = vrot.lane.b32.xlu2 %v1255_v57, %s2181_s29  ;;  %v1268_v58 = vpack.c.bf16 %v1255_v57, %v1255_v57  ;;  %s2641_s27 = smov 24  }
 0x970   : > { %1259 = vrot.lane.b32.xlu0 %v1255_v57, %s2180_s4  ;;  %s2642_s4 = smov 16  }
 0x971   : > { %v1273_v59 = vunpack.c.l.b16 %v1268_v58 }
 0x973   : > { %v2471_v61 = vpack.c.b16 %v1273_v59, %v1273_v59 }
 0x974   : > { %v1256_v60 = vpop.f32.mrf.mxu0 }
 0x977   : > { %1275 = vrot.lane.b32.xlu1 %v2471_v61, %s2182_s30 }
 0x9c9   : > { %v1263_v3 = vpop.permute.xlu2 %1262 }
 0x9ca   : > { %v1270_v7 = vpack.c.bf16 %v1263_v3, %v1263_v3 }
 0x9cc   : > { %v1321_v12 = vunpack.c.l.b16 %v1270_v7 }
 0x9ce   : > { %v1322_v13 = vpack.c.b16 %v1321_v12, %v1321_v12 }
 0x9e1   : > { %v1266_v63 = vpop.permute.xlu1 %1265 }
 0x9e2   : > { %v1271_v0 = vpack.c.bf16 %v1266_v63, %v1266_v63  ;;  %v1260_v1 = vpop.permute.xlu0 %1259 }
 0x9e3   : > { %v1269_v2 = vpack.c.bf16 %v1260_v1, %v1260_v1 }
 0x9e4   : > { %v1345_v4 = vunpack.c.l.b16 %v1271_v0 }
 0x9e5   : > { %v1297_v5 = vunpack.c.l.b16 %v1269_v2 }
 0x9e6   : > { %v1346_v6 = vpack.c.b16 %v1345_v4, %v1345_v4 }
 0x9e7   : > { %v2475_v9 = vpack.c.b16 %v1297_v5, %v1297_v5 }
 0x9e8   : > { %1347 = vrot.lane.b32.xlu2 %v1346_v6, %s2182_s30 }
 0x9e9   : > { %1299 = vrot.lane.b32.xlu0 %v2475_v9, %s2182_s30  ;;  %v1276_v10 = vpop.permute.xlu1 %1275 }
 0x9ea   : > { %v1281_v11 = vsel %vm743_vm5, %v1276_v10, 0 }
 0x9eb   : > { %1290 = vmatpush.bf16.xpose.msrb.mxu1 %v1281_v11 }
 0x9f1   : > { %1323 = vrot.lane.b32.xlu0 %v1322_v13, %s2182_s30 }
 0x9f2   : > { %1969 = vmatmul.msk.bf16.vlgmr.msrb.gmra.mxu1 %vm743_vm5, %v1268_v58 }
 0xa42   : > { %v1348_v14 = vpop.permute.xlu2 %1347 }
 0xa43   : > { %v1353_v15 = vsel %vm743_vm5, %v1348_v14, 0 }
 0xa44   : > { %1362 = vmatpush.bf16.xpose.msra.mxu0 %v1353_v15 }
 0xa4b   : > { %1972 = vmatmul.msk.bf16.vlgmr.msra.gmra.mxu0 %vm743_vm5, %v1271_v0 }
 0xa5b   : > { %v1300_v16 = vpop.permute.xlu0 %1299 }
 0xa5c   : > { %v1305_v17 = vsel %vm743_vm5, %v1300_v16, 0 }
 0xa5d   : > { %1314 = vmatpush.bf16.xpose.msrb.mxu2 %v1305_v17 }
 0xa63   : > { %v1324_v18 = vpop.permute.xlu0 %1323 }
 0xa64   : > { %v1329_v19 = vsel %vm743_vm5, %v1324_v18, 0  ;;  %1970 = vmatmul.msk.bf16.vlgmr.msrb.gmra.mxu2 %vm743_vm5, %v1269_v2 }
 0xa65   : > { %1338 = vmatpush.bf16.xpose.msrb.mxu3 %v1329_v19 }
 0xa6c   : > { %1971 = vmatmul.msk.bf16.vlgmr.msrb.gmra.mxu3 %vm743_vm5, %v1270_v7 }
 0xa6f   : > { %v1292_v20 = vpop.f32.mrf.mxu1 }
 0xa70   : > { %v1293_v28 = vadd.f32 %v1292_v20, %v2362_v62 }
 0xa72   : > { %v1368_v34 = vsel %vm743_vm5, %v1293_v28, -inf }
 0xa77   : > { %v1294_v21 = vpop.f32.mrf.mxu1 }
 0xac8   : > { %v1364_v22 = vpop.f32.mrf.mxu0 }
 0xac9   : > { %v1365_v23 = vadd.f32 %v1364_v22, %v2362_v62 }
 0xacb   : > { %v1377_v24 = vsel %vm743_vm5, %v1365_v23, -inf }
 0xacc   : > { %1378 = vmax.xlane.f32.xlu1 %v1377_v24 }
 0xad0   : > { %v1366_v25 = vpop.f32.mrf.mxu0 }
 0xae7   : > { %v1316_v26 = vpop.f32.mrf.mxu2 }
 0xae8   : > { %v1317_v27 = vadd.f32 %v1316_v26, %v2362_v62  ;;  %v2068_v26 = vld [vmem:[%s2612_s6 + $0x18] sm:$0xff] }
 0xaea   : > { %v1371_v30 = vsel %vm743_vm5, %v1317_v27, -inf }
 0xaeb   : > { %1372 = vmax.xlane.f32.xlu0 %v1371_v30 }
 0xaef   : > { %v1318_v29 = vpop.f32.mrf.mxu2  ;;  %v1340_v31 = vpop.f32.mrf.mxu3 }
 0xaf0   : > { %v1341_v32 = vadd.f32 %v1340_v31, %v2362_v62 }
 0xaf2   : > { %v1374_v33 = vsel %vm743_vm5, %v1341_v32, -inf }
 0xaf3   : > { %1375 = vmax.xlane.f32.xlu2 %v1374_v33  ;;  %1369 = vmax.xlane.f32.xlu0 %v1368_v34 }
 0xaf7   : > { %v1342_v35 = vpop.f32.mrf.mxu3 }
 0xaf8   : > { %v2107_v35 = vld [vmem:[%s2613_s7 + $0x1] ss:$0 sm:$0xff] }
 0xb3f   : > { %v1379_v36 = vpop.xlane.xlu1 %1378 }
 0xb40   : > { %v1383_v37 = vsub.f32 %v1365_v23, %v1379_v36 }
 0xb42   : > { %v1390_v38 = vmul.f32 1.442695, %v1383_v37 }
 0xb44   : > { %2144 = vpow2.f32 %v1390_v38 }
 0xb4a   : > { %v2145_v40 = vpop.eup %2144 }
 0xb4b   : > { %v1401_v39 = vsel %vm743_vm5, %v2145_v40, 0.0 }
 0xb4c   : > { %1402 = vadd.xlane.f32.xlu0 %v1401_v39 }
 0xb5e   : > { %v1373_v41 = vpop.xlane.xlu0 %1372 }
 0xb5f   : > { %v1381_v42 = vsub.f32 %v1317_v27, %v1373_v41  ;;  %v2067_v27 = vld [vmem:[%s2612_s6 + $0x10] sm:$0xff] }
 0xb60   : > { %1479 = vrot.lane.b32.xlu0 %v1346_v6, %s2183_s25 }
 0xb61   : > { %v1386_v62 = vmul.f32 1.442695, %v1381_v42 }
 0xb63   : > { %2146 = vpow2.f32 %v1386_v62 }
 0xb66   : > { %v1376_v43 = vpop.xlane.xlu2 %1375  ;;  %v1370_v50 = vpop.xlane.xlu0 %1369 }
 0xb67   : > { %v1382_v44 = vsub.f32 %v1341_v32, %v1376_v43  ;;  %v1380_v51 = vsub.f32 %v1293_v28, %v1370_v50 }
 0xb68   : > { %1416 = vrot.lane.b32.xlu0 %v2471_v61, %s2183_s25 }
 0xb69   : > { %v2147_v45 = vpop.eup %2146  ;;  %v1388_v46 = vmul.f32 1.442695, %v1382_v44  ;;  %v1384_v52 = vmul.f32 1.442695, %v1380_v51 }
 0xb6a   : > { %v1395_v47 = vsel %vm743_vm5, %v2147_v45, 0.0 }
 0xb6b   : > { %2148 = vpow2.f32 %v1388_v46  ;;  %1396 = vadd.xlane.f32.xlu2 %v1395_v47 }
 0xb6c   : > { %2150 = vpow2.f32 %v1384_v52 }
 0xb71   : > { %v2149_v48 = vpop.eup %2148 }
 0xb72   : > { %v1398_v49 = vsel %vm743_vm5, %v2149_v48, 0.0  ;;  %v2151_v54 = vpop.eup %2150 }
 0xb73   : > { %1399 = vadd.xlane.f32.xlu1 %v1398_v49  ;;  %v1392_v55 = vsel %vm743_vm5, %v2151_v54, 0.0 }
 0xb83   : > { %1437 = vrot.lane.b32.xlu2 %v2475_v9, %s2183_s25 }
 0xb8c   : > { %1458 = vrot.lane.b32.xlu1 %v1322_v13, %s2183_s25 }
 0xbac   : > { %1393 = vadd.xlane.f32.xlu2 %v1392_v55 }
 0xbbf   : > { %v1403_v56 = vpop.xlane.xlu0 %1402 }
 0xbc0   : > { %2152 = vrcp.f32 %v1403_v56  ;;  %v2108_v56 = vld [vmem:[%s2614_s8 + $0x1] ss:$0 sm:$0xff] }
 0xbc6   : > { %v2153_v57 = vpop.eup %2152 }
 0xbc7   : > { %v1411_v58 = vmul.f32 %v2153_v57, %v2145_v40 }
 0xbc9   : > { %v1415_v61 = vpack.c.bf16 %v1411_v58, %v1411_v58  ;;  %v2109_v58 = vld [vmem:[%s2615_s9 + $0x1] ss:$0 sm:$0xff] }
 0xbd2   : > { %v1480_v59 = vpop.permute.xlu0 %1479 }
 0xbd3   : > { %v1485_v60 = vsel %vm888_vm6, %v1480_v59, 0 }
 0xbd4   : > { %1494 = vmatpush.bf16.msrb.mxu0 %v1485_v60 }
 0xbd7   : > { %1976 = vmatmul.msk.bf16.vlgmr.msrb.gmra.mxu0 %vm743_vm5, %v1415_v61 }
 0xbda   : > { %v1417_v63 = vpop.permute.xlu0 %1416 }
 0xbdb   : > { %v1422_v0 = vsel %vm888_vm6, %v1417_v63, 0 }
 0xbdc   : > { %1431 = vmatpush.bf16.msra.mxu1 %v1422_v0  ;;  %v2110_v0 = vld [vmem:[%s2617_s11 + $0x1] ss:$0 sm:$0xff] }
 0xbde   : > { %v1397_v1 = vpop.xlane.xlu2 %1396 }
 0xbdf   : > { %2154 = vrcp.f32 %v1397_v1 }
 0xbe0   : > { %1547 = vmatpush.bf16.msrb.mxu1 %v2068_v26 }
 0xbe4   : > { %1548 = vmatpush.bf16.msrb.mxu1 %v2067_v27 }
 0xbe5   : > { %v2155_v2 = vpop.eup %2154 }
 0xbe6   : > { %v1409_v3 = vmul.f32 %v2155_v2, %v2147_v45  ;;  %v1438_v4 = vpop.permute.xlu2 %1437  ;;  %v1400_v7 = vpop.xlane.xlu1 %1399  ;;  %v2070_v45 = vld [vmem:[%s2616_s10 + $0x18] sm:$0xff] }
 0xbe7   : > { %v1443_v5 = vsel %vm888_vm6, %v1438_v4, 0  ;;  %2156 = vrcp.f32 %v1400_v7 }
 0xbe8   : > { %v1413_v6 = vpack.c.bf16 %v1409_v3, %v1409_v3  ;;  %1452 = vmatpush.bf16.msra.mxu2 %v1443_v5 }
 0xbeb   : > { %1974 = vmatmul.msk.bf16.vlgmr.msra.gmra.mxu2 %vm743_vm5, %v1413_v6 }
 0xbec   : > { %1621 = vmatpush.bf16.msrb.mxu2 %v2070_v45 }
 0xbed   : > { %v2157_v9 = vpop.eup %2156 }
 0xbee   : > { %v1410_v10 = vmul.f32 %v2157_v9, %v2149_v48  ;;  %v2074_v9 = vld [vmem:[%s2618_s12 + $0x38] sm:$0xff] }
 0xbf0   : > { %v1414_v13 = vpack.c.bf16 %v1410_v10, %v1410_v10  ;;  %v2073_v10 = vld [vmem:[%s2618_s12 + $0x30] sm:$0xff] }
 0xbfe   : > { %v1459_v11 = vpop.permute.xlu1 %1458 }
 0xbff   : > { %v1464_v12 = vsel %vm888_vm6, %v1459_v11, 0 }
 0xc00   : > { %1473 = vmatpush.bf16.msra.mxu3 %v1464_v12 }
 0xc03   : > { %1975 = vmatmul.msk.bf16.vlgmr.msra.gmra.mxu3 %vm743_vm5, %v1414_v13  ;;  %v2072_v13 = vld [vmem:[%s2618_s12 + $0x28] sm:$0xff] }
 0xc04   : > { %1714 = vmatpush.bf16.msrb.mxu3 %v2074_v9  ;;  %v2078_v9 = vld [vmem:[%s2624_s18 + $0x8] sm:$0xff] }
 0xc08   : > { %1715 = vmatpush.bf16.msrb.mxu3 %v2073_v10  ;;  %v2077_v10 = vld [vmem:[%s2624_s18] sm:$0xff] }
 0xc0c   : > { %1716 = vmatpush.bf16.msrb.mxu3 %v2072_v13 }
 0xc1f   : > { %v1394_v14 = vpop.xlane.xlu2 %1393 }
 0xc20   : > { %2158 = vrcp.f32 %v1394_v14 }
 0xc26   : > { %v2159_v15 = vpop.eup %2158 }
 0xc27   : > { %v1408_v16 = vmul.f32 %v2159_v15, %v2151_v54 }
 0xc29   : > { %v1412_v17 = vpack.c.bf16 %v1408_v16, %v1408_v16 }
 0xc2b   : > { %1973 = vmatmul.msk.bf16.vlgmr.msra.gmra.mxu1 %vm743_vm5, %v1412_v17 }
 0xc2c   : > { %1826 = vmatpush.bf16.msra.mxu1 %v2078_v9 }
 0xc30   : > { %1827 = vmatpush.bf16.msra.mxu1 %v2077_v10 }
 0xc54   : > { %v1496_v18 = vpop.f32.mrf.mxu0 }
 0xc5c   : > { %v1498_v19 = vpop.f32.mrf.mxu0 }
 0xc6e   : > { %v1454_v20 = vpop.f32.mrf.mxu2 }
 0xc6f   : > { %1501 = vrot.lane.b32.xlu1 %v1454_v20, %s2184_s3 }
 0xc76   : > { %v1456_v21 = vpop.f32.mrf.mxu2 }
 0xc77   : > { %1509 = vrot.lane.b32.xlu1 %v1496_v18, %s2641_s27  ;;  %v2071_v18 = vld [vmem:[%s2618_s12 + $0x20] sm:$0xff] }
 0xc78   : > { %1717 = vmatpush.bf16.msrb.mxu3 %v2071_v18 }
 0xc86   : > { %v1475_v22 = vpop.f32.mrf.mxu3 }
 0xc87   : > { %1505 = vrot.lane.b32.xlu0 %v1475_v22, %s2642_s4 }
 0xc8e   : > { %v1477_v23 = vpop.f32.mrf.mxu3 }
 0xca8   : > { %v1433_v24 = vpop.f32.mrf.mxu1 }
 0xcb0   : > { %v1435_v25 = vpop.f32.mrf.mxu1 }
 0xce1   : > { %v1502_v30 = vpop.permute.xlu1 %1501 }
 0xce2   : > { %v1512_v28 = vsel %vm743_vm5, %v1433_v24, %v1502_v30 }
 0xce9   : > { %v1510_v31 = vpop.permute.xlu1 %1509 }
 0xcf9   : > { %v1506_v29 = vpop.permute.xlu0 %1505 }
 0xcfa   : > { %v1513_v32 = vsel %vm981_vm7, %v1512_v28, %v1506_v29 }
 0xcfb   : > { %v1514_v33 = vsel %vm983_vm8, %v1513_v32, %v1510_v31 }
 0xcfc   : > { %v1522_v34 = vpack.c.bf16 %v1514_v33, %v1514_v33 }
 0xcfe   : > { %1990 = vmatmul.msk.bf16.vlgmr.msrb.gmra.mxu1 %vm643_vm0, %v1522_v34 }
 0xd7b   : > { %v1550_v36 = vpop.f32.mrf.mxu1 }
 0xd7c   : > { %v1551_v37 = vadd.f32 %v2107_v35, %v1550_v36 }
 0xd7e   : > { %v1554_v38 = vadd.f32 %v1551_v37, %v2460_v53  ;;  %v2069_v53 = vld [vmem:[%s2616_s10 + $0x10] sm:$0xff] }
 0xd7f   : > { %1622 = vmatpush.bf16.msrb.mxu2 %v2069_v53 }
 0xd80   : > { %v1559_v40 = vsel %vm643_vm0, %v1554_v38, 0.0 }
 0xd81   : > { %1560 = vadd.xlane.f32.xlu0 %v1559_v40 }
 0xd83   : > { %v1552_v39 = vpop.f32.mrf.mxu1 }
 0xdf4   : > { %v1561_v41 = vpop.xlane.xlu0 %1560 }
 0xdf5   : > { %v1562_v42 = vmul.f32 %v1561_v41, %v2309_v8 }
 0xdf7   : > { %v1563_v62 = vsub.f32 %v1554_v38, %v1562_v42 }
 0xdf9   : > { %v1564_v43 = vmul.f32 %v1563_v62, %v1563_v62 }
 0xdfb   : > { %v1565_v44 = vsel %vm643_vm0, %v1564_v43, 0.0  ;;  %v2111_v43 = vld [vmem:[%s2619_s13 + $0x1] ss:$0 sm:$0xff] }
 0xdfc   : > { %1566 = vadd.xlane.f32.xlu1 %v1565_v44 }
 0xe6f   : > { %v1567_v46 = vpop.xlane.xlu1 %1566 }
 0xe70   : > { %v1568_v47 = vmul.f32 %v1567_v46, %v2309_v8 }
 0xe72   : > { %v1569_v48 = vadd.f32 1e-12, %v1568_v47 }
 0xe74   : > { %2160 = vrsqrt.f32 %v1569_v48  ;;  %vm1576_vm6 = vweird.f32 %v1569_v48 }
 0xe7a   : > { %v2161_v49 = vpop.eup %2160 }
 0xe7b   : > { %v1571_v50 = vmul.f32 %v2161_v49, %v1569_v48  ;;  %vm1577_vm5 = vweird.f32 %v2161_v49 }
 0xe7c   : > { %vm1578_vm7 = vmor %vm1576_vm6, %vm1577_vm5 }
 0xe7d   : > { %v1572_v51 = vmul.f32 %v2161_v49, %v1571_v50 }
 0xe7f   : > { %v1573_v52 = vmul.f32 0.5, %v1572_v51 }
 0xe81   : > { %v1574_v54 = vsub.f32 1.5, %v1573_v52 }
 0xe83   : > { %v1575_v55 = vmul.f32 %v2161_v49, %v1574_v54  ;;  %v2076_v54 = vld [vmem:[%s2622_s16 + $0x8] sm:$0xff] }
 0xe84   : > { %1788 = vmatpush.bf16.msra.mxu0 %v2076_v54 }
 0xe85   : > { %v1579_v57 = vsel %vm1578_vm7, %v2161_v49, %v1575_v55  ;;  %v2075_v55 = vld [vmem:[%s2622_s16] sm:$0xff] }
 0xe86   : > { %v1580_v59 = vmul.f32 %v1579_v57, %v1563_v62 }
 0xe88   : > { %v1584_v60 = vmul.f32 %v2108_v56, %v1580_v59  ;;  %1789 = vmatpush.bf16.msra.mxu0 %v2075_v55 }
 0xe8a   : > { %v1588_v61 = vadd.f32 %v2109_v58, %v1584_v60 }
 0xe8c   : > { %v1596_v63 = vpack.c.bf16 %v1588_v61, %v1588_v61 }
 0xe8e   : > { %2006 = vmatmul.msk.bf16.vlgmr.msrb.gmra.mxu2 %vm643_vm0, %v1596_v63 }
 0xf11   : > { %v1624_v1 = vpop.f32.mrf.mxu2 }
 0xf12   : > { %v1625_v2 = vadd.f32 %v2110_v0, %v1624_v1 }
 0xf14   : > { %v1629_v3 = vmul.f32 0.70710677, %v1625_v2  ;;  %v1628_v39 = vmul.f32 0.5, %v1625_v2  ;;  %v2112_v2 = vld [vmem:[%s2620_s14 + $0x1] ss:$0 sm:$0xff] }
 0xf16   : > { %v1630_v4 = vand.u32 2147483647, %v1629_v3  ;;  %vm1663_vm13 = vcmp.ge.f32.partialorder %v1629_v3, 0.0 }
 0xf18   : > { %v1631_v5 = vmul.f32 0.3275911, %v1630_v4  ;;  %v1657_v23 = vsub.f32 0.0, %v1630_v4 }
 0xf19   : > { %v1626_v6 = vpop.f32.mrf.mxu2 }
 0xf1a   : > { %v1632_v7 = vadd.f32 1.0, %v1631_v5  ;;  %v1658_v26 = vmul.f32 %v1657_v23, %v1630_v4 }
 0xf1c   : > { %2162 = vrcp.f32 %v1632_v7  ;;  %v1644_v15 = vand.u32 2147483648, %v1632_v7  ;;  %v1642_v17 = vand.u32 2147483647, %v1632_v7  ;;  %vm1638_vm10 = vweird.f32 %v1632_v7 }
 0xf1d   : > { %v1659_v28 = vmul.f32 1.442695, %v1658_v26 }
 0xf1e   : > { %v1645_v20 = vor.u32 1.1754944e-38, %v1644_v15  ;;  %vm1643_vm12 = vcmp.eq.f32.partialorder %v1642_v17, 8.507059e+37  ;;  %v2115_v17 = vld [vmem:[%s2625_s19] ss:$0 sm:$0xff] }
 0xf1f   : > { %2164 = vpow2.f32 %v1659_v28 }
 0xf22   : > { %v2163_v11 = vpop.eup %2162 }
 0xf23   : > { %v1634_v12 = vmul.f32 %v2163_v11, %v1632_v7  ;;  %vm1639_vm8 = vweird.f32 %v2163_v11 }
 0xf24   : > { %vm1640_vm11 = vmor %vm1638_vm10, %vm1639_vm8 }
 0xf25   : > { %v1635_v14 = vsub.f32 1.0, %v1634_v12  ;;  %v2165_v35 = vpop.eup %2164 }
 0xf27   : > { %v1636_v16 = vmul.f32 %v2163_v11, %v1635_v14 }
 0xf29   : > { %v1637_v19 = vadd.f32 %v2163_v11, %v1636_v16 }
 0xf2b   : > { %v1641_v21 = vsel %vm1640_vm11, %v2163_v11, %v1637_v19  ;;  %v2114_v11 = vld [vmem:[%s2623_s17] ss:$0 sm:$0xff] }
 0xf2c   : > { %v1646_v22 = vsel %vm1643_vm12, %v1645_v20, %v1641_v21 }
 0xf2d   : > { %v1648_v24 = vmul.f32 1.0614054, %v1646_v22 }
 0xf2f   : > { %v1649_v25 = vadd.f32 -1.4531521, %v1648_v24 }
 0xf31   : > { %v1650_v27 = vmul.f32 %v1649_v25, %v1646_v22 }
 0xf33   : > { %v1651_v30 = vadd.f32 1.4214138, %v1650_v27 }
 0xf35   : > { %v1652_v29 = vmul.f32 %v1651_v30, %v1646_v22 }
 0xf37   : > { %v1653_v31 = vadd.f32 -0.28449672, %v1652_v29 }
 0xf39   : > { %v1654_v32 = vmul.f32 %v1653_v31, %v1646_v22 }
 0xf3b   : > { %v1655_v33 = vadd.f32 0.2548296, %v1654_v32 }
 0xf3d   : > { %v1656_v34 = vmul.f32 %v1655_v33, %v1646_v22 }
 0xf3f   : > { %v1661_v36 = vmul.f32 %v2165_v35, %v1656_v34 }
 0xf41   : > { %v1662_v37 = vsub.f32 1.0, %v1661_v36 }
 0xf43   : > { %v1664_v38 = vsub.f32 0.0, %v1662_v37 }
 0xf45   : > { %v1665_v40 = vsel %vm1663_vm13, %v1662_v37, %v1664_v38 }
 0xf46   : > { %v1666_v41 = vadd.f32 1.0, %v1665_v40 }
 0xf48   : > { %v1667_v42 = vmul.f32 %v1666_v41, %v1628_v39 }
 0xf4a   : > { %v1679_v62 = vpack.c.bf16 %v1667_v42, %v1667_v42 }
 0xf4c   : > { %2032 = vmatmul.msk.bf16.vlgmr.msrb.gmra.mxu3 %vm1169_vm2, %v1679_v62 }
 0xfcf   : > { %v1719_v44 = vpop.f32.mrf.mxu3 }
 0xfd0   : > { %v1720_v45 = vadd.f32 %v2111_v43, %v1719_v44 }
 0xfd2   : > { %v1723_v53 = vadd.f32 %v1720_v45, %v1588_v61 }
 0xfd4   : > { %v1728_v46 = vsel %vm643_vm0, %v1723_v53, 0.0 }
 0xfd5   : > { %1729 = vadd.xlane.f32.xlu2 %v1728_v46 }
 0xfd7   : > { %v1721_v47 = vpop.f32.mrf.mxu3 }
0x1048   : > { %v1730_v48 = vpop.xlane.xlu2 %1729 }
0x1049   : > { %v1731_v49 = vmul.f32 %v1730_v48, %v2309_v8 }
0x104b   : > { %v1732_v50 = vsub.f32 %v1723_v53, %v1731_v49 }
0x104d   : > { %v1733_v51 = vmul.f32 %v1732_v50, %v1732_v50 }
0x104f   : > { %v1734_v52 = vsel %vm643_vm0, %v1733_v51, 0.0 }
0x1050   : > { %1735 = vadd.xlane.f32.xlu2 %v1734_v52 }
0x10c3   : > { %v1736_v56 = vpop.xlane.xlu2 %1735 }
0x10c4   : > { %v1737_v57 = vmul.f32 %v1736_v56, %v2309_v8  ;;  %v2113_v8 = vld [vmem:[%s2621_s15 + $0x1] ss:$0 sm:$0xff] }
0x10c6   : > { %v1738_v58 = vadd.f32 1e-12, %v1737_v57 }
0x10c8   : > { %2166 = vrsqrt.f32 %v1738_v58  ;;  %vm1745_vm15 = vweird.f32 %v1738_v58 }
0x10ce   : > { %v2167_v59 = vpop.eup %2166 }
0x10cf   : > { %v1740_v60 = vmul.f32 %v2167_v59, %v1738_v58  ;;  %vm1746_vm14 = vweird.f32 %v2167_v59 }
0x10d0   : > { %vm1747_vm1 = vmor %vm1745_vm15, %vm1746_vm14 }
0x10d1   : > { %v1741_v61 = vmul.f32 %v2167_v59, %v1740_v60 }
0x10d3   : > { %v1742_v63 = vmul.f32 0.5, %v1741_v61 }
0x10d5   : > { %v1743_v0 = vsub.f32 1.5, %v1742_v63 }
0x10d7   : > { %v1744_v1 = vmul.f32 %v2167_v59, %v1743_v0 }
0x10d9   : > { %v1748_v3 = vsel %vm1747_vm1, %v2167_v59, %v1744_v1 }
0x10da   : > { %v1749_v4 = vmul.f32 %v1748_v3, %v1732_v50 }
0x10dc   : > { %v1753_v5 = vmul.f32 %v2112_v2, %v1749_v4 }
0x10de   : > { %v1757_v6 = vadd.f32 %v2113_v8, %v1753_v5 }
0x10e0   : > { %v1763_v7 = vpack.c.bf16 %v1757_v6, %v1757_v6 }
0x10e2   : > { %2043 = vmatmul.msk.bf16.vlgmr.msra.gmra.mxu0 %vm643_vm0, %v1763_v7 }
0x115f   : > { %v1791_v12 = vpop.f32.mrf.mxu0 }
0x1160   : > { %v1792_v13 = vadd.f32 %v2114_v11, %v1791_v12 }
0x1162   : > { %2168 = vtanh.f32 %v1792_v13 }
0x1167   : > { %v1793_v14 = vpop.f32.mrf.mxu0 }
0x1168   : > { %v2169_v15 = vpop.eup %2168 }
0x1169   : > { %v1801_v16 = vpack.c.bf16 %v2169_v15, %v2169_v15 }
0x116b   : > { %2052 = vmatmul.msk.bf16.vlgmr.msra.gmra.mxu1 %vm643_vm0, %v1801_v16 }
0x11e8   : > { %v1829_v18 = vpop.f32.mrf.mxu1 }
0x11e9   : > { %v1830_v19 = vadd.f32 %v2115_v17, %v1829_v18 }
0x11eb   : > { %1833 = vst [vmem:[%s638_s2] sm:$0xff] %v1830_v19 }
0x11f0   : > { %v1831_v20 = vpop.f32.mrf.mxu1 }
0x11f1 PF: > { %s30_s1 = sadd.s32 1, %s2176_s1  }
0x11f2   : > { %p27_p4 = scmp.ge.s32.totalorder %s30_s1, 4  }
0x11f4   :  { %29 = sbr.rel (!%p27_p4) target bundleno = 6 (0x6), region = 145 }

</bundles_post_ra>
